<compile_context>
chip_gen: v7x
topology: tpu7x:2x2x1
jax: 0.10.0
libtpu: 0.0.40
codegen_flags: <defaults>
</compile_context>

<pallas_src>
import functools
import math

import jax
import jax.numpy as jnp
from jax import lax
from jax.experimental import pallas as pl
from jax.experimental.pallas import tpu as pltpu

# ----------------------------- tiny BERT config -----------------------------
VOCAB        = 100
HIDDEN       = 32
N_LAYERS     = 2
N_HEADS      = 2
HEAD_DIM     = HIDDEN // N_HEADS
INTERMEDIATE = 64
MAX_POS      = 16
NUM_LABELS   = 6          # num_labels of EmotionClassifier
PAD_LABELS   = 128        # lane-dense classifier output, sliced to NUM_LABELS outside
BATCH        = 2
SEQ          = 8
LN_EPS       = 1e-12      # BERT LayerNorm eps
BATCH_TILE   = 1          # batch tile for the 'parallel' grid axis (v7x: 2 TCs)


# ------------------------------ fused kernel --------------------------------
def _layernorm(x, g, b):
    mu = jnp.mean(x, axis=-1, keepdims=True)
    var = jnp.mean((x - mu) * (x - mu), axis=-1, keepdims=True)
    return (x - mu) * lax.rsqrt(var + LN_EPS) * g + b


def _bert_layer_kernel(emb_ref, neg_ref, eg_ref, eb_ref,
                       wqkv_ref, bqkv_ref, wo_ref, bo_ref,
                       g1_ref, b1_ref,
                       wf1_ref, bf1_ref, wf2_ref, bf2_ref,
                       g2_ref, b2_ref,
                       pw_ref, pb_ref, cw_ref, cb_ref,
                       out_ref,
                       x_scr,
                       *, bt, seq):
    """One grid step = one encoder layer for one batch tile.

    grid = (B // bt, N_LAYERS); the layer axis is 'arbitrary' (sequential) and
    the running activation persists in the VMEM scratch `x_scr`.  Per-layer
    weights stream in via their BlockSpec index_map (double-buffered).
    """
    BT, S, H, NH, HD = bt, seq, HIDDEN, N_HEADS, HEAD_DIM
    l = pl.program_id(1)
    bf16 = jnp.bfloat16

    # ---- embedding LayerNorm, once per batch tile (layer 0 only) ----
    @pl.when(l == 0)
    def _():
        x_scr[...] = _layernorm(emb_ref[...].reshape(BT * S, H),
                                eg_ref[...], eb_ref[...])

    x = x_scr[...]                                               # [BT*S, H] f32

    # ---- fused QKV projection (1/sqrt(hd) folded into Q weights/bias) ----
    qkv = jnp.dot(x.astype(bf16), wqkv_ref[0],
                  preferred_element_type=jnp.float32) + bqkv_ref[0]   # [BT*S, 3H]

    def split_heads(t):                       # [BT*S, H] -> [NH*BT, S, HD]
        t = t.reshape(BT, S, H)
        return jnp.concatenate(
            [t[:, :, h * HD:(h + 1) * HD] for h in range(NH)], axis=0)

    q = split_heads(qkv[:, 0 * H:1 * H])
    k = split_heads(qkv[:, 1 * H:2 * H])
    v = split_heads(qkv[:, 2 * H:3 * H])

    # ---- attention: all heads batched into single einsums ----
    neg = jnp.concatenate([neg_ref[...]] * NH, axis=0)           # [NH*BT, 1, S]
    s = jnp.einsum('bqd,bkd->bqk', q.astype(bf16), k.astype(bf16),
                   preferred_element_type=jnp.float32)           # [NH*BT, S, S]
    s = s + neg
    s = s - jnp.max(s, axis=-1, keepdims=True)
    p = jnp.exp(s)
    p = p * pl.reciprocal(jnp.sum(p, axis=-1, keepdims=True), approx=True)
    ctx = jnp.einsum('bqk,bkd->bqd', p.astype(bf16), v.astype(bf16),
                     preferred_element_type=jnp.float32)         # [NH*BT, S, HD]
    # merge heads back into the feature dim (head-major, matches Wo row layout)
    ctx = jnp.concatenate([ctx[h * BT:(h + 1) * BT] for h in range(NH)],
                          axis=-1).reshape(BT * S, H)
    attn = jnp.dot(ctx.astype(bf16), wo_ref[0],
                   preferred_element_type=jnp.float32) + bo_ref[0]

    x = _layernorm(attn + x, g1_ref[0], b1_ref[0])               # [BT*S, H]

    is_last = l == pl.num_programs(1) - 1

    def ffn_ln2(inp):
        h = jnp.dot(inp.astype(bf16), wf1_ref[0],
                    preferred_element_type=jnp.float32) + bf1_ref[0]
        # TODO(synk): HF BERT uses exact (erf) GELU; tanh approximation used here.
        h = jax.nn.gelu(h, approximate=True)
        h = jnp.dot(h.astype(bf16), wf2_ref[0],
                    preferred_element_type=jnp.float32) + bf2_ref[0]
        return _layernorm(h + inp, g2_ref[0], b2_ref[0])

    @pl.when(jnp.logical_not(is_last))
    def _():
        x_scr[...] = ffn_ln2(x)

    @pl.when(is_last)
    def _():
        # Only the CLS token feeds the pooler -> run FFN/LN2 on CLS rows only.
        cls = x.reshape(BT, S, H)[:, 0:1, :].reshape(BT, H)
        cls = ffn_ln2(cls)
        pooled = jnp.tanh(jnp.dot(cls.astype(bf16), pw_ref[...],
                                  preferred_element_type=jnp.float32) + pb_ref[...])
        logits = jnp.dot(pooled.astype(bf16), cw_ref[...],
                         preferred_element_type=jnp.float32) + cb_ref[...]
        out_ref[...] = logits.reshape(BT, 1, PAD_LABELS).astype(out_ref.dtype)


# --------------------------- parameter construction --------------------------
def init_params(key):
    keys = list(jax.random.split(key, 16 + N_LAYERS * 16))
    it = iter(keys)

    def w(shape):
        return jax.random.normal(next(it), shape, jnp.float32) * 0.02

    params = {
        "word_emb": w((VOCAB, HIDDEN)),
        "pos_emb":  w((MAX_POS, HIDDEN)),
        "type_emb": w((2, HIDDEN)),
        "emb_ln_g": jnp.ones((1, HIDDEN), jnp.float32),
        "emb_ln_b": jnp.zeros((1, HIDDEN), jnp.float32),
        "layers":   [],
        "pool_w":   w((HIDDEN, HIDDEN)),
        "pool_b":   jnp.zeros((HIDDEN,), jnp.float32),
        "cls_w":    w((HIDDEN, NUM_LABELS)),
        "cls_b":    jnp.zeros((NUM_LABELS,), jnp.float32),
    }
    for _ in range(N_LAYERS):
        params["layers"].append({
            "q_w": w((HIDDEN, HIDDEN)),       "q_b": jnp.zeros((HIDDEN,), jnp.float32),
            "k_w": w((HIDDEN, HIDDEN)),       "k_b": jnp.zeros((HIDDEN,), jnp.float32),
            "v_w": w((HIDDEN, HIDDEN)),       "v_b": jnp.zeros((HIDDEN,), jnp.float32),
            "o_w": w((HIDDEN, HIDDEN)),       "o_b": jnp.zeros((HIDDEN,), jnp.float32),
            "ln1_g": jnp.ones((1, HIDDEN), jnp.float32),
            "ln1_b": jnp.zeros((1, HIDDEN), jnp.float32),
            "ff1_w": w((HIDDEN, INTERMEDIATE)), "ff1_b": jnp.zeros((INTERMEDIATE,), jnp.float32),
            "ff2_w": w((INTERMEDIATE, HIDDEN)), "ff2_b": jnp.zeros((HIDDEN,), jnp.float32),
            "ln2_g": jnp.ones((1, HIDDEN), jnp.float32),
            "ln2_b": jnp.zeros((1, HIDDEN), jnp.float32),
        })
    return params


def pack_params(params):
    """Stack per-layer weights ([L, ...] for streamed BlockSpecs), fuse QKV,
    fold the attention scale into Q, cast matmul weights to bf16 (MXU-native),
    and lane-pad the classifier head.  Biases / LN params stay f32."""
    scale = 1.0 / math.sqrt(HEAD_DIM)
    bf16 = jnp.bfloat16
    L = params["layers"]
    packed = {
        "word_emb": params["word_emb"],
        "pos_emb":  params["pos_emb"],
        "type_emb": params["type_emb"],
        "emb_ln_g": params["emb_ln_g"],
        "emb_ln_b": params["emb_ln_b"],
        # fused QKV: [L, H, 3H]; scale folded into Q weight & bias.
        "wqkv": jnp.stack([jnp.concatenate(
            [lp["q_w"] * scale, lp["k_w"], lp["v_w"]], axis=1) for lp in L]).astype(bf16),
        "bqkv": jnp.stack([jnp.concatenate(
            [lp["q_b"] * scale, lp["k_b"], lp["v_b"]])[None, :] for lp in L]),
        "wo":    jnp.stack([lp["o_w"] for lp in L]).astype(bf16),
        "bo":    jnp.stack([lp["o_b"][None, :] for lp in L]),
        "ln1_g": jnp.stack([lp["ln1_g"] for lp in L]),
        "ln1_b": jnp.stack([lp["ln1_b"] for lp in L]),
        "wff1":  jnp.stack([lp["ff1_w"] for lp in L]).astype(bf16),
        "bff1":  jnp.stack([lp["ff1_b"][None, :] for lp in L]),
        "wff2":  jnp.stack([lp["ff2_w"] for lp in L]).astype(bf16),
        "bff2":  jnp.stack([lp["ff2_b"][None, :] for lp in L]),
        "ln2_g": jnp.stack([lp["ln2_g"] for lp in L]),
        "ln2_b": jnp.stack([lp["ln2_b"] for lp in L]),
        "pool_w": params["pool_w"].astype(bf16),
        "pool_b": params["pool_b"][None, :],
        # classifier padded to PAD_LABELS lanes (zeros beyond NUM_LABELS)
        "cls_w_pad": jnp.zeros((HIDDEN, PAD_LABELS), jnp.float32)
                        .at[:, :NUM_LABELS].set(params["cls_w"]).astype(bf16),
        "cls_b_pad": jnp.zeros((1, PAD_LABELS), jnp.float32)
                        .at[0, :NUM_LABELS].set(params["cls_b"]),
    }
    return packed


# ------------------------------- forward pass --------------------------------
@jax.jit
def emotion_classifier_forward(packed, input_ids, attention_mask):
    """Equivalent of EmotionClassifier.forward: logits = classifier(bert(...).pooler_output)."""
    B, S = input_ids.shape
    H, I, H3 = HIDDEN, INTERMEDIATE, 3 * HIDDEN
    BT = BATCH_TILE

    # --- embedding lookups (gather is wrapper glue; LN fused in-kernel) ---
    we = packed["word_emb"][input_ids]                  # [B, S, H]
    pe = packed["pos_emb"][:S][None, :, :]              # [1, S, H]
    # TODO(synk): token_type_ids hard-coded to segment 0 (as in the reference usage).
    te = packed["type_emb"][0][None, None, :]
    emb = we + pe + te                                   # [B, S, H] f32

    # extended attention mask: (1 - m) * -10000, broadcast over heads in-kernel
    neg = ((1.0 - attention_mask.astype(jnp.float32)) * -10000.0)[:, None, :]   # [B, 1, S]

    def per_layer(shape):
        return pl.BlockSpec((1,) + shape, lambda b, l: (l,) + (0,) * len(shape))

    def shared(shape):
        return pl.BlockSpec(shape, lambda b, l: (0,) * len(shape))

    def per_batch(shape):
        return pl.BlockSpec((BT,) + shape, lambda b, l: (b,) + (0,) * len(shape))

    operands = (
        emb, neg,
        packed["emb_ln_g"], packed["emb_ln_b"],
        packed["wqkv"], packed["bqkv"], packed["wo"], packed["bo"],
        packed["ln1_g"], packed["ln1_b"],
        packed["wff1"], packed["bff1"], packed["wff2"], packed["bff2"],
        packed["ln2_g"], packed["ln2_b"],
        packed["pool_w"], packed["pool_b"],
        packed["cls_w_pad"], packed["cls_b_pad"],
    )
    in_specs = [
        per_batch((S, H)),                 # emb        [B, S, H]
        per_batch((1, S)),                 # neg mask   [B, 1, S]
        shared((1, H)), shared((1, H)),    # emb LN gamma / beta
        per_layer((H, H3)), per_layer((1, H3)),     # wqkv / bqkv
        per_layer((H, H)),  per_layer((1, H)),      # wo / bo
        per_layer((1, H)),  per_layer((1, H)),      # ln1 gamma / beta
        per_layer((H, I)),  per_layer((1, I)),      # wff1 / bff1
        per_layer((I, H)),  per_layer((1, H)),      # wff2 / bff2
        per_layer((1, H)),  per_layer((1, H)),      # ln2 gamma / beta
        shared((H, H)), shared((1, H)),             # pooler
        shared((H, PAD_LABELS)), shared((1, PAD_LABELS)),   # classifier (lane-padded)
    ]
    out_spec = pl.BlockSpec((BT, 1, PAD_LABELS), lambda b, l: (b, 0, 0))

    # advisory cost estimate for XLA's scheduler
    flops = 2 * N_LAYERS * B * S * H * H3
    flops += 2 * N_LAYERS * B * N_HEADS * S * S * HEAD_DIM * 2
    flops += 2 * N_LAYERS * B * S * H * H
    flops += 4 * (N_LAYERS - 1) * B * S * H * I + 4 * B * H * I
    flops += 2 * B * H * H + 2 * B * H * PAD_LABELS
    transcendentals = (N_LAYERS * B * N_HEADS * S * S
                       + (N_LAYERS - 1) * B * S * I + B * I + B * H)
    bytes_accessed = (sum(int(a.size) * a.dtype.itemsize for a in operands)
                      + B * PAD_LABELS * 4)

    logits_pad = pl.pallas_call(
        functools.partial(_bert_layer_kernel, bt=BT, seq=S),
        out_shape=jax.ShapeDtypeStruct((B, 1, PAD_LABELS), jnp.float32),
        grid_spec=pltpu.PrefetchScalarGridSpec(
            num_scalar_prefetch=0,
            grid=(B // BT, N_LAYERS),
            in_specs=in_specs,
            out_specs=out_spec,
            scratch_shapes=[pltpu.VMEM((BT * S, H), jnp.float32)]),
        compiler_params=pltpu.CompilerParams(
            dimension_semantics=("parallel", "arbitrary"),
            vmem_limit_bytes=48 * 1024 * 1024),
        cost_estimate=pl.CostEstimate(flops=flops,
                                      transcendentals=transcendentals,
                                      bytes_accessed=bytes_accessed),
    )(*operands)

    return logits_pad[:, 0, :NUM_LABELS]


# ----------------------------------- main ------------------------------------
if __name__ == "__main__":
    key = jax.random.PRNGKey(0)
    pkey, dkey = jax.random.split(key)

    params = init_params(pkey)
    packed = pack_params(params)

    input_ids = jax.random.randint(dkey, (BATCH, SEQ), 0, VOCAB, dtype=jnp.int32)
    # mask: second example has 2 padding positions at the end
    attention_mask = jnp.array([[1] * SEQ,
                                [1] * (SEQ - 2) + [0] * 2], dtype=jnp.int32)

    logits = emotion_classifier_forward(packed, input_ids, attention_mask)
    logits = jax.block_until_ready(logits)
    assert logits.shape == (BATCH, NUM_LABELS)
    assert bool(jnp.all(jnp.isfinite(logits)))
    print("KERNEL_OK")
</pallas_src>

<mosaic_0001>
module attributes {stable_mosaic.version = 11 : i64} {
  func.func @_bert_layer_kernel(%arg0: i32, %arg1: i32, %arg2: memref<1x8x32xf32, #tpu.memory_space<vmem>>, %arg3: memref<1x1x8xf32, #tpu.memory_space<vmem>>, %arg4: memref<1x32xf32, #tpu.memory_space<vmem>>, %arg5: memref<1x32xf32, #tpu.memory_space<vmem>>, %arg6: memref<1x32x96xbf16, #tpu.memory_space<vmem>>, %arg7: memref<1x1x96xf32, #tpu.memory_space<vmem>>, %arg8: memref<1x32x32xbf16, #tpu.memory_space<vmem>>, %arg9: memref<1x1x32xf32, #tpu.memory_space<vmem>>, %arg10: memref<1x1x32xf32, #tpu.memory_space<vmem>>, %arg11: memref<1x1x32xf32, #tpu.memory_space<vmem>>, %arg12: memref<1x32x64xbf16, #tpu.memory_space<vmem>>, %arg13: memref<1x1x64xf32, #tpu.memory_space<vmem>>, %arg14: memref<1x64x32xbf16, #tpu.memory_space<vmem>>, %arg15: memref<1x1x32xf32, #tpu.memory_space<vmem>>, %arg16: memref<1x1x32xf32, #tpu.memory_space<vmem>>, %arg17: memref<1x1x32xf32, #tpu.memory_space<vmem>>, %arg18: memref<32x32xbf16, #tpu.memory_space<vmem>>, %arg19: memref<1x32xf32, #tpu.memory_space<vmem>>, %arg20: memref<32x128xbf16, #tpu.memory_space<vmem>>, %arg21: memref<1x128xf32, #tpu.memory_space<vmem>>, %arg22: memref<1x1x128xf32, #tpu.memory_space<vmem>>, %arg23: memref<8x32xf32, #tpu.memory_space<vmem>>) attributes {dimension_semantics = [#tpu.dimension_semantics<parallel>, #tpu.dimension_semantics<arbitrary>], iteration_bounds = array<i64: 2, 2>, scalar_prefetch = 0 : i64, scratch_operands = 1 : i64, tpu.core_type = #tpu.core_type<tc>, window_params = [{transform_indices = @transform_0, window_bounds = array<i64: 1, 8, 32>}, {transform_indices = @transform_1, window_bounds = array<i64: 1, 1, 8>}, {pipeline_mode = #tpu.pipeline_mode<synchronous>, transform_indices = @transform_2, window_bounds = array<i64: 1, 32>}, {pipeline_mode = #tpu.pipeline_mode<synchronous>, transform_indices = @transform_3, window_bounds = array<i64: 1, 32>}, {transform_indices = @transform_4, window_bounds = array<i64: 1, 32, 96>}, {transform_indices = @transform_5, window_bounds = array<i64: 1, 1, 96>}, {transform_indices = @transform_6, window_bounds = array<i64: 1, 32, 32>}, {transform_indices = @transform_7, window_bounds = array<i64: 1, 1, 32>}, {transform_indices = @transform_8, window_bounds = array<i64: 1, 1, 32>}, {transform_indices = @transform_9, window_bounds = array<i64: 1, 1, 32>}, {transform_indices = @transform_10, window_bounds = array<i64: 1, 32, 64>}, {transform_indices = @transform_11, window_bounds = array<i64: 1, 1, 64>}, {transform_indices = @transform_12, window_bounds = array<i64: 1, 64, 32>}, {transform_indices = @transform_13, window_bounds = array<i64: 1, 1, 32>}, {transform_indices = @transform_14, window_bounds = array<i64: 1, 1, 32>}, {transform_indices = @transform_15, window_bounds = array<i64: 1, 1, 32>}, {pipeline_mode = #tpu.pipeline_mode<synchronous>, transform_indices = @transform_16, window_bounds = array<i64: 32, 32>}, {pipeline_mode = #tpu.pipeline_mode<synchronous>, transform_indices = @transform_17, window_bounds = array<i64: 1, 32>}, {pipeline_mode = #tpu.pipeline_mode<synchronous>, transform_indices = @transform_18, window_bounds = array<i64: 32, 128>}, {pipeline_mode = #tpu.pipeline_mode<synchronous>, transform_indices = @transform_19, window_bounds = array<i64: 1, 128>}, {transform_indices = @transform_20, window_bounds = array<i64: 1, 1, 128>}]} {
    %c0_i32 = arith.constant 0 : i32
    %0 = arith.cmpi eq, %arg1, %c0_i32 : i32
    %1 = arith.extui %0 : i1 to i32
    %c0_i32_0 = arith.constant 0 : i32
    %2 = arith.cmpi ne, %1, %c0_i32_0 : i32
    scf.if %2 {
      %c0_35 = arith.constant 0 : index
      %c0_36 = arith.constant 0 : index
      %c0_37 = arith.constant 0 : index
      %94 = vector.load %arg2[%c0_35, %c0_36, %c0_37] : memref<1x8x32xf32, #tpu.memory_space<vmem>>, vector<1x8x32xf32>
      %95 = vector.shape_cast %94 : vector<1x8x32xf32> to vector<8x32xf32>
      %c0_38 = arith.constant 0 : index
      %c0_39 = arith.constant 0 : index
      %96 = vector.load %arg4[%c0_38, %c0_39] : memref<1x32xf32, #tpu.memory_space<vmem>>, vector<1x32xf32>
      %c0_40 = arith.constant 0 : index
      %c0_41 = arith.constant 0 : index
      %97 = vector.load %arg5[%c0_40, %c0_41] : memref<1x32xf32, #tpu.memory_space<vmem>>, vector<1x32xf32>
      %cst_42 = arith.constant dense<0.000000e+00> : vector<8xf32>
      %98 = vector.multi_reduction <add>, %95, %cst_42 [1] : vector<8x32xf32> to vector<8xf32>
      %99 = vector.shape_cast %98 : vector<8xf32> to vector<8x1xf32>
      %cst_43 = arith.constant 3.200000e+01 : f32
      %100 = vector.broadcast %cst_43 : f32 to vector<8x1xf32>
      %101 = arith.divf %99, %100 : vector<8x1xf32>
      %102 = vector.broadcast %101 : vector<8x1xf32> to vector<8x32xf32>
      %103 = arith.subf %95, %102 : vector<8x32xf32>
      %104 = vector.broadcast %101 : vector<8x1xf32> to vector<8x32xf32>
      %105 = arith.subf %95, %104 : vector<8x32xf32>
      %106 = arith.mulf %103, %105 : vector<8x32xf32>
      %cst_44 = arith.constant dense<0.000000e+00> : vector<8xf32>
      %107 = vector.multi_reduction <add>, %106, %cst_44 [1] : vector<8x32xf32> to vector<8xf32>
      %108 = vector.shape_cast %107 : vector<8xf32> to vector<8x1xf32>
      %cst_45 = arith.constant 3.200000e+01 : f32
      %109 = vector.broadcast %cst_45 : f32 to vector<8x1xf32>
      %110 = arith.divf %108, %109 : vector<8x1xf32>
      %111 = vector.broadcast %101 : vector<8x1xf32> to vector<8x32xf32>
      %112 = arith.subf %95, %111 : vector<8x32xf32>
      %cst_46 = arith.constant 9.99999996E-13 : f32
      %113 = vector.broadcast %cst_46 : f32 to vector<8x1xf32>
      %114 = arith.addf %110, %113 : vector<8x1xf32>
      %115 = math.rsqrt %114 : vector<8x1xf32>
      %116 = vector.broadcast %115 : vector<8x1xf32> to vector<8x32xf32>
      %117 = arith.mulf %112, %116 : vector<8x32xf32>
      %118 = vector.broadcast %96 : vector<1x32xf32> to vector<8x32xf32>
      %119 = arith.mulf %117, %118 : vector<8x32xf32>
      %120 = vector.broadcast %97 : vector<1x32xf32> to vector<8x32xf32>
      %121 = arith.addf %119, %120 : vector<8x32xf32>
      %c0_47 = arith.constant 0 : index
      %c0_48 = arith.constant 0 : index
      %122 = vector.load %arg23[%c0_47, %c0_48] : memref<8x32xf32, #tpu.memory_space<vmem>>, vector<8x32xf32>
      tpu.vector_store %arg23[%c0_47, %c0_48], %121 {strides = array<i32>} : memref<8x32xf32, #tpu.memory_space<vmem>>, vector<8x32xf32>,
    } else {
    }
    %c0 = arith.constant 0 : index
    %c0_1 = arith.constant 0 : index
    %3 = vector.load %arg23[%c0, %c0_1] : memref<8x32xf32, #tpu.memory_space<vmem>>, vector<8x32xf32>
    %4 = arith.truncf %3 : vector<8x32xf32> to vector<8x32xbf16>
    %c0_2 = arith.constant 0 : index
    %c0_3 = arith.constant 0 : index
    %c0_4 = arith.constant 0 : index
    %5 = vector.load %arg6[%c0_2, %c0_3, %c0_4] : memref<1x32x96xbf16, #tpu.memory_space<vmem>>, vector<1x32x96xbf16>
    %6 = vector.shape_cast %5 : vector<1x32x96xbf16> to vector<32x96xbf16>
    %cst = arith.constant dense<0.000000e+00> : vector<8x96xf32>
    %7 = tpu.matmul %4, %6, %cst {dimension_numbers = #tpu.dot_dimension_numbers<[1], [0], [0], [1], [0, 0, 1, 1], [], []>} : vector<8x32xbf16>, vector<32x96xbf16>, vector<8x96xf32> -> vector<8x96xf32>
    %c0_5 = arith.constant 0 : index
    %c0_6 = arith.constant 0 : index
    %c0_7 = arith.constant 0 : index
    %8 = vector.load %arg7[%c0_5, %c0_6, %c0_7] : memref<1x1x96xf32, #tpu.memory_space<vmem>>, vector<1x1x96xf32>
    %9 = vector.shape_cast %8 : vector<1x1x96xf32> to vector<1x96xf32>
    %10 = vector.broadcast %9 : vector<1x96xf32> to vector<8x96xf32>
    %11 = arith.addf %7, %10 : vector<8x96xf32>
    %12 = vector.extract_strided_slice %11 {offsets = [0, 0], sizes = [8, 32], strides = [1, 1]} : vector<8x96xf32> to vector<8x32xf32>
    %13 = vector.shape_cast %12 : vector<8x32xf32> to vector<1x8x32xf32>
    %14 = vector.extract_strided_slice %13 {offsets = [0, 0, 0], sizes = [1, 8, 16], strides = [1, 1, 1]} : vector<1x8x32xf32> to vector<1x8x16xf32>
    %15 = vector.extract_strided_slice %13 {offsets = [0, 0, 16], sizes = [1, 8, 16], strides = [1, 1, 1]} : vector<1x8x32xf32> to vector<1x8x16xf32>
    %16 = tpu.concatenate %14, %15 in 0 : vector<1x8x16xf32>, vector<1x8x16xf32> -> vector<2x8x16xf32>
    %17 = vector.extract_strided_slice %11 {offsets = [0, 32], sizes = [8, 32], strides = [1, 1]} : vector<8x96xf32> to vector<8x32xf32>
    %18 = vector.shape_cast %17 : vector<8x32xf32> to vector<1x8x32xf32>
    %19 = vector.extract_strided_slice %18 {offsets = [0, 0, 0], sizes = [1, 8, 16], strides = [1, 1, 1]} : vector<1x8x32xf32> to vector<1x8x16xf32>
    %20 = vector.extract_strided_slice %18 {offsets = [0, 0, 16], sizes = [1, 8, 16], strides = [1, 1, 1]} : vector<1x8x32xf32> to vector<1x8x16xf32>
    %21 = tpu.concatenate %19, %20 in 0 : vector<1x8x16xf32>, vector<1x8x16xf32> -> vector<2x8x16xf32>
    %22 = vector.extract_strided_slice %11 {offsets = [0, 64], sizes = [8, 32], strides = [1, 1]} : vector<8x96xf32> to vector<8x32xf32>
    %23 = vector.shape_cast %22 : vector<8x32xf32> to vector<1x8x32xf32>
    %24 = vector.extract_strided_slice %23 {offsets = [0, 0, 0], sizes = [1, 8, 16], strides = [1, 1, 1]} : vector<1x8x32xf32> to vector<1x8x16xf32>
    %25 = vector.extract_strided_slice %23 {offsets = [0, 0, 16], sizes = [1, 8, 16], strides = [1, 1, 1]} : vector<1x8x32xf32> to vector<1x8x16xf32>
    %26 = tpu.concatenate %24, %25 in 0 : vector<1x8x16xf32>, vector<1x8x16xf32> -> vector<2x8x16xf32>
    %c0_8 = arith.constant 0 : index
    %c0_9 = arith.constant 0 : index
    %c0_10 = arith.constant 0 : index
    %27 = vector.load %arg3[%c0_8, %c0_9, %c0_10] : memref<1x1x8xf32, #tpu.memory_space<vmem>>, vector<1x1x8xf32>
    %28 = tpu.concatenate %27, %27 in 0 : vector<1x1x8xf32>, vector<1x1x8xf32> -> vector<2x1x8xf32>
    %29 = arith.truncf %16 : vector<2x8x16xf32> to vector<2x8x16xbf16>
    %30 = arith.truncf %21 : vector<2x8x16xf32> to vector<2x8x16xbf16>
    "tpu.trace_start"() <{level = 10 : i32, message = "bqd,bkd->bqk"}> : () -> ()
    %cst_11 = arith.constant dense<0.000000e+00> : vector<2x8x8xf32>
    %31 = tpu.matmul %29, %30, %cst_11 {dimension_numbers = #tpu.dot_dimension_numbers<[2], [2], [1], [1], [0, 0, 0, 1, 1, 1], [0], [0]>} : vector<2x8x16xbf16>, vector<2x8x16xbf16>, vector<2x8x8xf32> -> vector<2x8x8xf32>
    "tpu.trace_stop"() : () -> ()
    %32 = vector.broadcast %28 : vector<2x1x8xf32> to vector<2x8x8xf32>
    %33 = arith.addf %31, %32 : vector<2x8x8xf32>
    %cst_12 = arith.constant dense<0xFF800000> : vector<2x8xf32>
    %34 = vector.multi_reduction <maximumf>, %33, %cst_12 [2] : vector<2x8x8xf32> to vector<2x8xf32>
    %35 = vector.shape_cast %34 : vector<2x8xf32> to vector<2x8x1xf32>
    %36 = vector.broadcast %35 : vector<2x8x1xf32> to vector<2x8x8xf32>
    %37 = arith.subf %33, %36 : vector<2x8x8xf32>
    %38 = math.exp %37 : vector<2x8x8xf32>
    %cst_13 = arith.constant dense<0.000000e+00> : vector<2x8xf32>
    %39 = vector.multi_reduction <add>, %38, %cst_13 [2] : vector<2x8x8xf32> to vector<2x8xf32>
    %40 = vector.shape_cast %39 : vector<2x8xf32> to vector<2x8x1xf32>
    %41 = tpu.reciprocal %40 {approx = true} : vector<2x8x1xf32> -> vector<2x8x1xf32>
    %42 = vector.broadcast %41 : vector<2x8x1xf32> to vector<2x8x8xf32>
    %43 = arith.mulf %38, %42 : vector<2x8x8xf32>
    %44 = arith.truncf %43 : vector<2x8x8xf32> to vector<2x8x8xbf16>
    %45 = arith.truncf %26 : vector<2x8x16xf32> to vector<2x8x16xbf16>
    "tpu.trace_start"() <{level = 10 : i32, message = "bqk,bkd->bqd"}> : () -> ()
    %cst_14 = arith.constant dense<0.000000e+00> : vector<2x8x16xf32>
    %46 = tpu.matmul %44, %45, %cst_14 {dimension_numbers = #tpu.dot_dimension_numbers<[2], [1], [1], [2], [0, 0, 0, 1, 1, 2], [0], [0]>} : vector<2x8x8xbf16>, vector<2x8x16xbf16>, vector<2x8x16xf32> -> vector<2x8x16xf32>
    "tpu.trace_stop"() : () -> ()
    %47 = vector.extract_strided_slice %46 {offsets = [0, 0, 0], sizes = [1, 8, 16], strides = [1, 1, 1]} : vector<2x8x16xf32> to vector<1x8x16xf32>
    %48 = vector.extract_strided_slice %46 {offsets = [1, 0, 0], sizes = [1, 8, 16], strides = [1, 1, 1]} : vector<2x8x16xf32> to vector<1x8x16xf32>
    %49 = tpu.concatenate %47, %48 in 2 : vector<1x8x16xf32>, vector<1x8x16xf32> -> vector<1x8x32xf32>
    %50 = vector.shape_cast %49 : vector<1x8x32xf32> to vector<8x32xf32>
    %51 = arith.truncf %50 : vector<8x32xf32> to vector<8x32xbf16>
    %c0_15 = arith.constant 0 : index
    %c0_16 = arith.constant 0 : index
    %c0_17 = arith.constant 0 : index
    %52 = vector.load %arg8[%c0_15, %c0_16, %c0_17] : memref<1x32x32xbf16, #tpu.memory_space<vmem>>, vector<1x32x32xbf16>
    %53 = vector.shape_cast %52 : vector<1x32x32xbf16> to vector<32x32xbf16>
    %cst_18 = arith.constant dense<0.000000e+00> : vector<8x32xf32>
    %54 = tpu.matmul %51, %53, %cst_18 {dimension_numbers = #tpu.dot_dimension_numbers<[1], [0], [0], [1], [0, 0, 1, 1], [], []>} : vector<8x32xbf16>, vector<32x32xbf16>, vector<8x32xf32> -> vector<8x32xf32>
    %c0_19 = arith.constant 0 : index
    %c0_20 = arith.constant 0 : index
    %c0_21 = arith.constant 0 : index
    %55 = vector.load %arg9[%c0_19, %c0_20, %c0_21] : memref<1x1x32xf32, #tpu.memory_space<vmem>>, vector<1x1x32xf32>
    %56 = vector.shape_cast %55 : vector<1x1x32xf32> to vector<1x32xf32>
    %57 = vector.broadcast %56 : vector<1x32xf32> to vector<8x32xf32>
    %58 = arith.addf %54, %57 : vector<8x32xf32>
    %59 = arith.addf %58, %3 : vector<8x32xf32>
    %c0_22 = arith.constant 0 : index
    %c0_23 = arith.constant 0 : index
    %c0_24 = arith.constant 0 : index
    %60 = vector.load %arg10[%c0_22, %c0_23, %c0_24] : memref<1x1x32xf32, #tpu.memory_space<vmem>>, vector<1x1x32xf32>
    %61 = vector.shape_cast %60 : vector<1x1x32xf32> to vector<1x32xf32>
    %c0_25 = arith.constant 0 : index
    %c0_26 = arith.constant 0 : index
    %c0_27 = arith.constant 0 : index
    %62 = vector.load %arg11[%c0_25, %c0_26, %c0_27] : memref<1x1x32xf32, #tpu.memory_space<vmem>>, vector<1x1x32xf32>
    %63 = vector.shape_cast %62 : vector<1x1x32xf32> to vector<1x32xf32>
    %cst_28 = arith.constant dense<0.000000e+00> : vector<8xf32>
    %64 = vector.multi_reduction <add>, %59, %cst_28 [1] : vector<8x32xf32> to vector<8xf32>
    %65 = vector.shape_cast %64 : vector<8xf32> to vector<8x1xf32>
    %cst_29 = arith.constant 3.200000e+01 : f32
    %66 = vector.broadcast %cst_29 : f32 to vector<8x1xf32>
    %67 = arith.divf %65, %66 : vector<8x1xf32>
    %68 = vector.broadcast %67 : vector<8x1xf32> to vector<8x32xf32>
    %69 = arith.subf %59, %68 : vector<8x32xf32>
    %70 = vector.broadcast %67 : vector<8x1xf32> to vector<8x32xf32>
    %71 = arith.subf %59, %70 : vector<8x32xf32>
    %72 = arith.mulf %69, %71 : vector<8x32xf32>
    %cst_30 = arith.constant dense<0.000000e+00> : vector<8xf32>
    %73 = vector.multi_reduction <add>, %72, %cst_30 [1] : vector<8x32xf32> to vector<8xf32>
    %74 = vector.shape_cast %73 : vector<8xf32> to vector<8x1xf32>
    %cst_31 = arith.constant 3.200000e+01 : f32
    %75 = vector.broadcast %cst_31 : f32 to vector<8x1xf32>
    %76 = arith.divf %74, %75 : vector<8x1xf32>
    %77 = vector.broadcast %67 : vector<8x1xf32> to vector<8x32xf32>
    %78 = arith.subf %59, %77 : vector<8x32xf32>
    %cst_32 = arith.constant 9.99999996E-13 : f32
    %79 = vector.broadcast %cst_32 : f32 to vector<8x1xf32>
    %80 = arith.addf %76, %79 : vector<8x1xf32>
    %81 = math.rsqrt %80 : vector<8x1xf32>
    %82 = vector.broadcast %81 : vector<8x1xf32> to vector<8x32xf32>
    %83 = arith.mulf %78, %82 : vector<8x32xf32>
    %84 = vector.broadcast %61 : vector<1x32xf32> to vector<8x32xf32>
    %85 = arith.mulf %83, %84 : vector<8x32xf32>
    %86 = vector.broadcast %63 : vector<1x32xf32> to vector<8x32xf32>
    %87 = arith.addf %85, %86 : vector<8x32xf32>
    %c1_i32 = arith.constant 1 : i32
    %88 = arith.cmpi eq, %arg1, %c1_i32 : i32
    %true = arith.constant true
    %89 = arith.xori %88, %true : i1
    %90 = arith.extui %89 : i1 to i32
    %c0_i32_33 = arith.constant 0 : i32
    %91 = arith.cmpi ne, %90, %c0_i32_33 : i32
    scf.if %91 {
      %94 = arith.truncf %87 : vector<8x32xf32> to vector<8x32xbf16>
      %c0_35 = arith.constant 0 : index
      %c0_36 = arith.constant 0 : index
      %c0_37 = arith.constant 0 : index
      %95 = vector.load %arg12[%c0_35, %c0_36, %c0_37] : memref<1x32x64xbf16, #tpu.memory_space<vmem>>, vector<1x32x64xbf16>
      %96 = vector.shape_cast %95 : vector<1x32x64xbf16> to vector<32x64xbf16>
      %cst_38 = arith.constant dense<0.000000e+00> : vector<8x64xf32>
      %97 = tpu.matmul %94, %96, %cst_38 {dimension_numbers = #tpu.dot_dimension_numbers<[1], [0], [0], [1], [0, 0, 1, 1], [], []>} : vector<8x32xbf16>, vector<32x64xbf16>, vector<8x64xf32> -> vector<8x64xf32>
      %c0_39 = arith.constant 0 : index
      %c0_40 = arith.constant 0 : index
      %c0_41 = arith.constant 0 : index
      %98 = vector.load %arg13[%c0_39, %c0_40, %c0_41] : memref<1x1x64xf32, #tpu.memory_space<vmem>>, vector<1x1x64xf32>
      %99 = vector.shape_cast %98 : vector<1x1x64xf32> to vector<1x64xf32>
      %100 = vector.broadcast %99 : vector<1x64xf32> to vector<8x64xf32>
      %101 = arith.addf %97, %100 : vector<8x64xf32>
      %102 = arith.mulf %101, %101 : vector<8x64xf32>
      %103 = arith.mulf %101, %102 : vector<8x64xf32>
      %cst_42 = arith.constant 4.471500e-02 : f32
      %104 = vector.broadcast %cst_42 : f32 to vector<8x64xf32>
      %105 = arith.mulf %104, %103 : vector<8x64xf32>
      %106 = arith.addf %101, %105 : vector<8x64xf32>
      %cst_43 = arith.constant 0.797884583 : f32
      %107 = vector.broadcast %cst_43 : f32 to vector<8x64xf32>
      %108 = arith.mulf %107, %106 : vector<8x64xf32>
      %109 = math.tanh %108 : vector<8x64xf32>
      %cst_44 = arith.constant 1.000000e+00 : f32
      %110 = vector.broadcast %cst_44 : f32 to vector<8x64xf32>
      %111 = arith.addf %110, %109 : vector<8x64xf32>
      %cst_45 = arith.constant 5.000000e-01 : f32
      %112 = vector.broadcast %cst_45 : f32 to vector<8x64xf32>
      %113 = arith.mulf %112, %111 : vector<8x64xf32>
      %114 = arith.mulf %101, %113 : vector<8x64xf32>
      %115 = arith.truncf %114 : vector<8x64xf32> to vector<8x64xbf16>
      %c0_46 = arith.constant 0 : index
      %c0_47 = arith.constant 0 : index
      %c0_48 = arith.constant 0 : index
      %116 = vector.load %arg14[%c0_46, %c0_47, %c0_48] : memref<1x64x32xbf16, #tpu.memory_space<vmem>>, vector<1x64x32xbf16>
      %117 = vector.shape_cast %116 : vector<1x64x32xbf16> to vector<64x32xbf16>
      %cst_49 = arith.constant dense<0.000000e+00> : vector<8x32xf32>
      %118 = tpu.matmul %115, %117, %cst_49 {dimension_numbers = #tpu.dot_dimension_numbers<[1], [0], [0], [1], [0, 0, 1, 1], [], []>} : vector<8x64xbf16>, vector<64x32xbf16>, vector<8x32xf32> -> vector<8x32xf32>
      %c0_50 = arith.constant 0 : index
      %c0_51 = arith.constant 0 : index
      %c0_52 = arith.constant 0 : index
      %119 = vector.load %arg15[%c0_50, %c0_51, %c0_52] : memref<1x1x32xf32, #tpu.memory_space<vmem>>, vector<1x1x32xf32>
      %120 = vector.shape_cast %119 : vector<1x1x32xf32> to vector<1x32xf32>
      %121 = vector.broadcast %120 : vector<1x32xf32> to vector<8x32xf32>
      %122 = arith.addf %118, %121 : vector<8x32xf32>
      %123 = arith.addf %122, %87 : vector<8x32xf32>
      %c0_53 = arith.constant 0 : index
      %c0_54 = arith.constant 0 : index
      %c0_55 = arith.constant 0 : index
      %124 = vector.load %arg16[%c0_53, %c0_54, %c0_55] : memref<1x1x32xf32, #tpu.memory_space<vmem>>, vector<1x1x32xf32>
      %125 = vector.shape_cast %124 : vector<1x1x32xf32> to vector<1x32xf32>
      %c0_56 = arith.constant 0 : index
      %c0_57 = arith.constant 0 : index
      %c0_58 = arith.constant 0 : index
      %126 = vector.load %arg17[%c0_56, %c0_57, %c0_58] : memref<1x1x32xf32, #tpu.memory_space<vmem>>, vector<1x1x32xf32>
      %127 = vector.shape_cast %126 : vector<1x1x32xf32> to vector<1x32xf32>
      %cst_59 = arith.constant dense<0.000000e+00> : vector<8xf32>
      %128 = vector.multi_reduction <add>, %123, %cst_59 [1] : vector<8x32xf32> to vector<8xf32>
      %129 = vector.shape_cast %128 : vector<8xf32> to vector<8x1xf32>
      %cst_60 = arith.constant 3.200000e+01 : f32
      %130 = vector.broadcast %cst_60 : f32 to vector<8x1xf32>
      %131 = arith.divf %129, %130 : vector<8x1xf32>
      %132 = vector.broadcast %131 : vector<8x1xf32> to vector<8x32xf32>
      %133 = arith.subf %123, %132 : vector<8x32xf32>
      %134 = vector.broadcast %131 : vector<8x1xf32> to vector<8x32xf32>
      %135 = arith.subf %123, %134 : vector<8x32xf32>
      %136 = arith.mulf %133, %135 : vector<8x32xf32>
      %cst_61 = arith.constant dense<0.000000e+00> : vector<8xf32>
      %137 = vector.multi_reduction <add>, %136, %cst_61 [1] : vector<8x32xf32> to vector<8xf32>
      %138 = vector.shape_cast %137 : vector<8xf32> to vector<8x1xf32>
      %cst_62 = arith.constant 3.200000e+01 : f32
      %139 = vector.broadcast %cst_62 : f32 to vector<8x1xf32>
      %140 = arith.divf %138, %139 : vector<8x1xf32>
      %141 = vector.broadcast %131 : vector<8x1xf32> to vector<8x32xf32>
      %142 = arith.subf %123, %141 : vector<8x32xf32>
      %cst_63 = arith.constant 9.99999996E-13 : f32
      %143 = vector.broadcast %cst_63 : f32 to vector<8x1xf32>
      %144 = arith.addf %140, %143 : vector<8x1xf32>
      %145 = math.rsqrt %144 : vector<8x1xf32>
      %146 = vector.broadcast %145 : vector<8x1xf32> to vector<8x32xf32>
      %147 = arith.mulf %142, %146 : vector<8x32xf32>
      %148 = vector.broadcast %125 : vector<1x32xf32> to vector<8x32xf32>
      %149 = arith.mulf %147, %148 : vector<8x32xf32>
      %150 = vector.broadcast %127 : vector<1x32xf32> to vector<8x32xf32>
      %151 = arith.addf %149, %150 : vector<8x32xf32>
      %c0_64 = arith.constant 0 : index
      %c0_65 = arith.constant 0 : index
      %152 = vector.load %arg23[%c0_64, %c0_65] : memref<8x32xf32, #tpu.memory_space<vmem>>, vector<8x32xf32>
      tpu.vector_store %arg23[%c0_64, %c0_65], %151 {strides = array<i32>} : memref<8x32xf32, #tpu.memory_space<vmem>>, vector<8x32xf32>,
    } else {
    }
    %92 = arith.extui %88 : i1 to i32
    %c0_i32_34 = arith.constant 0 : i32
    %93 = arith.cmpi ne, %92, %c0_i32_34 : i32
    scf.if %93 {
      %94 = vector.shape_cast %87 : vector<8x32xf32> to vector<1x8x32xf32>
      %95 = vector.extract_strided_slice %94 {offsets = [0, 0, 0], sizes = [1, 1, 32], strides = [1, 1, 1]} : vector<1x8x32xf32> to vector<1x1x32xf32>
      %96 = vector.shape_cast %95 : vector<1x1x32xf32> to vector<1x32xf32>
      %97 = arith.truncf %96 : vector<1x32xf32> to vector<1x32xbf16>
      %c0_35 = arith.constant 0 : index
      %c0_36 = arith.constant 0 : index
      %c0_37 = arith.constant 0 : index
      %98 = vector.load %arg12[%c0_35, %c0_36, %c0_37] : memref<1x32x64xbf16, #tpu.memory_space<vmem>>, vector<1x32x64xbf16>
      %99 = vector.shape_cast %98 : vector<1x32x64xbf16> to vector<32x64xbf16>
      %cst_38 = arith.constant dense<0.000000e+00> : vector<1x64xf32>
      %100 = tpu.matmul %97, %99, %cst_38 {dimension_numbers = #tpu.dot_dimension_numbers<[1], [0], [0], [1], [0, 0, 1, 1], [], []>} : vector<1x32xbf16>, vector<32x64xbf16>, vector<1x64xf32> -> vector<1x64xf32>
      %c0_39 = arith.constant 0 : index
      %c0_40 = arith.constant 0 : index
      %c0_41 = arith.constant 0 : index
      %101 = vector.load %arg13[%c0_39, %c0_40, %c0_41] : memref<1x1x64xf32, #tpu.memory_space<vmem>>, vector<1x1x64xf32>
      %102 = vector.shape_cast %101 : vector<1x1x64xf32> to vector<1x64xf32>
      %103 = arith.addf %100, %102 : vector<1x64xf32>
      %104 = arith.mulf %103, %103 : vector<1x64xf32>
      %105 = arith.mulf %103, %104 : vector<1x64xf32>
      %cst_42 = arith.constant 4.471500e-02 : f32
      %106 = vector.broadcast %cst_42 : f32 to vector<1x64xf32>
      %107 = arith.mulf %106, %105 : vector<1x64xf32>
      %108 = arith.addf %103, %107 : vector<1x64xf32>
      %cst_43 = arith.constant 0.797884583 : f32
      %109 = vector.broadcast %cst_43 : f32 to vector<1x64xf32>
      %110 = arith.mulf %109, %108 : vector<1x64xf32>
      %111 = math.tanh %110 : vector<1x64xf32>
      %cst_44 = arith.constant 1.000000e+00 : f32
      %112 = vector.broadcast %cst_44 : f32 to vector<1x64xf32>
      %113 = arith.addf %112, %111 : vector<1x64xf32>
      %cst_45 = arith.constant 5.000000e-01 : f32
      %114 = vector.broadcast %cst_45 : f32 to vector<1x64xf32>
      %115 = arith.mulf %114, %113 : vector<1x64xf32>
      %116 = arith.mulf %103, %115 : vector<1x64xf32>
      %117 = arith.truncf %116 : vector<1x64xf32> to vector<1x64xbf16>
      %c0_46 = arith.constant 0 : index
      %c0_47 = arith.constant 0 : index
      %c0_48 = arith.constant 0 : index
      %118 = vector.load %arg14[%c0_46, %c0_47, %c0_48] : memref<1x64x32xbf16, #tpu.memory_space<vmem>>, vector<1x64x32xbf16>
      %119 = vector.shape_cast %118 : vector<1x64x32xbf16> to vector<64x32xbf16>
      %cst_49 = arith.constant dense<0.000000e+00> : vector<1x32xf32>
      %120 = tpu.matmul %117, %119, %cst_49 {dimension_numbers = #tpu.dot_dimension_numbers<[1], [0], [0], [1], [0, 0, 1, 1], [], []>} : vector<1x64xbf16>, vector<64x32xbf16>, vector<1x32xf32> -> vector<1x32xf32>
      %c0_50 = arith.constant 0 : index
      %c0_51 = arith.constant 0 : index
      %c0_52 = arith.constant 0 : index
      %121 = vector.load %arg15[%c0_50, %c0_51, %c0_52] : memref<1x1x32xf32, #tpu.memory_space<vmem>>, vector<1x1x32xf32>
      %122 = vector.shape_cast %121 : vector<1x1x32xf32> to vector<1x32xf32>
      %123 = arith.addf %120, %122 : vector<1x32xf32>
      %124 = arith.addf %123, %96 : vector<1x32xf32>
      %c0_53 = arith.constant 0 : index
      %c0_54 = arith.constant 0 : index
      %c0_55 = arith.constant 0 : index
      %125 = vector.load %arg16[%c0_53, %c0_54, %c0_55] : memref<1x1x32xf32, #tpu.memory_space<vmem>>, vector<1x1x32xf32>
      %126 = vector.shape_cast %125 : vector<1x1x32xf32> to vector<1x32xf32>
      %c0_56 = arith.constant 0 : index
      %c0_57 = arith.constant 0 : index
      %c0_58 = arith.constant 0 : index
      %127 = vector.load %arg17[%c0_56, %c0_57, %c0_58] : memref<1x1x32xf32, #tpu.memory_space<vmem>>, vector<1x1x32xf32>
      %128 = vector.shape_cast %127 : vector<1x1x32xf32> to vector<1x32xf32>
      %cst_59 = arith.constant dense<0.000000e+00> : vector<1xf32>
      %129 = vector.multi_reduction <add>, %124, %cst_59 [1] : vector<1x32xf32> to vector<1xf32>
      %130 = vector.shape_cast %129 : vector<1xf32> to vector<1x1xf32>
      %cst_60 = arith.constant 3.200000e+01 : f32
      %131 = vector.broadcast %cst_60 : f32 to vector<1x1xf32>
      %132 = arith.divf %130, %131 : vector<1x1xf32>
      %133 = vector.broadcast %132 : vector<1x1xf32> to vector<1x32xf32>
      %134 = arith.subf %124, %133 : vector<1x32xf32>
      %135 = vector.broadcast %132 : vector<1x1xf32> to vector<1x32xf32>
      %136 = arith.subf %124, %135 : vector<1x32xf32>
      %137 = arith.mulf %134, %136 : vector<1x32xf32>
      %cst_61 = arith.constant dense<0.000000e+00> : vector<1xf32>
      %138 = vector.multi_reduction <add>, %137, %cst_61 [1] : vector<1x32xf32> to vector<1xf32>
      %139 = vector.shape_cast %138 : vector<1xf32> to vector<1x1xf32>
      %cst_62 = arith.constant 3.200000e+01 : f32
      %140 = vector.broadcast %cst_62 : f32 to vector<1x1xf32>
      %141 = arith.divf %139, %140 : vector<1x1xf32>
      %142 = vector.broadcast %132 : vector<1x1xf32> to vector<1x32xf32>
      %143 = arith.subf %124, %142 : vector<1x32xf32>
      %cst_63 = arith.constant 9.99999996E-13 : f32
      %144 = vector.broadcast %cst_63 : f32 to vector<1x1xf32>
      %145 = arith.addf %141, %144 : vector<1x1xf32>
      %146 = math.rsqrt %145 : vector<1x1xf32>
      %147 = vector.broadcast %146 : vector<1x1xf32> to vector<1x32xf32>
      %148 = arith.mulf %143, %147 : vector<1x32xf32>
      %149 = arith.mulf %148, %126 : vector<1x32xf32>
      %150 = arith.addf %149, %128 : vector<1x32xf32>
      %151 = arith.truncf %150 : vector<1x32xf32> to vector<1x32xbf16>
      %c0_64 = arith.constant 0 : index
      %c0_65 = arith.constant 0 : index
      %152 = vector.load %arg18[%c0_64, %c0_65] : memref<32x32xbf16, #tpu.memory_space<vmem>>, vector<32x32xbf16>
      %cst_66 = arith.constant dense<0.000000e+00> : vector<1x32xf32>
      %153 = tpu.matmul %151, %152, %cst_66 {dimension_numbers = #tpu.dot_dimension_numbers<[1], [0], [0], [1], [0, 0, 1, 1], [], []>} : vector<1x32xbf16>, vector<32x32xbf16>, vector<1x32xf32> -> vector<1x32xf32>
      %c0_67 = arith.constant 0 : index
      %c0_68 = arith.constant 0 : index
      %154 = vector.load %arg19[%c0_67, %c0_68] : memref<1x32xf32, #tpu.memory_space<vmem>>, vector<1x32xf32>
      %155 = arith.addf %153, %154 : vector<1x32xf32>
      %156 = math.tanh %155 : vector<1x32xf32>
      %157 = arith.truncf %156 : vector<1x32xf32> to vector<1x32xbf16>
      %c0_69 = arith.constant 0 : index
      %c0_70 = arith.constant 0 : index
      %158 = vector.load %arg20[%c0_69, %c0_70] : memref<32x128xbf16, #tpu.memory_space<vmem>>, vector<32x128xbf16>
      %cst_71 = arith.constant dense<0.000000e+00> : vector<1x128xf32>
      %159 = tpu.matmul %157, %158, %cst_71 {dimension_numbers = #tpu.dot_dimension_numbers<[1], [0], [0], [1], [0, 0, 1, 1], [], []>} : vector<1x32xbf16>, vector<32x128xbf16>, vector<1x128xf32> -> vector<1x128xf32>
      %c0_72 = arith.constant 0 : index
      %c0_73 = arith.constant 0 : index
      %160 = vector.load %arg21[%c0_72, %c0_73] : memref<1x128xf32, #tpu.memory_space<vmem>>, vector<1x128xf32>
      %161 = arith.addf %159, %160 : vector<1x128xf32>
      %162 = vector.shape_cast %161 : vector<1x128xf32> to vector<1x1x128xf32>
      %c0_74 = arith.constant 0 : index
      %c0_75 = arith.constant 0 : index
      %c0_76 = arith.constant 0 : index
      %163 = vector.load %arg22[%c0_74, %c0_75, %c0_76] : memref<1x1x128xf32, #tpu.memory_space<vmem>>, vector<1x1x128xf32>
      tpu.vector_store %arg22[%c0_74, %c0_75, %c0_76], %162 {strides = array<i32>} : memref<1x1x128xf32, #tpu.memory_space<vmem>>, vector<1x1x128xf32>,
    } else {
    }
    return
  }
  func.func @transform_0(%arg0: i32, %arg1: i32) -> (i32, i32, i32) {
    %c0_i32 = arith.constant 0 : i32
    %c0_i32_0 = arith.constant 0 : i32
    %c0_i32_1 = arith.constant 0 : i32
    return %arg0, %c0_i32, %c0_i32_0 : i32, i32, i32
  }
  func.func @transform_1(%arg0: i32, %arg1: i32) -> (i32, i32, i32) {
    %c0_i32 = arith.constant 0 : i32
    %c0_i32_0 = arith.constant 0 : i32
    %c0_i32_1 = arith.constant 0 : i32
    return %arg0, %c0_i32, %c0_i32_0 : i32, i32, i32
  }
  func.func @transform_2(%arg0: i32, %arg1: i32) -> (i32, i32) {
    %c0_i32 = arith.constant 0 : i32
    %c0_i32_0 = arith.constant 0 : i32
    %c0_i32_1 = arith.constant 0 : i32
    return %c0_i32, %c0_i32_0 : i32, i32
  }
  func.func @transform_3(%arg0: i32, %arg1: i32) -> (i32, i32) {
    %c0_i32 = arith.constant 0 : i32
    %c0_i32_0 = arith.constant 0 : i32
    %c0_i32_1 = arith.constant 0 : i32
    return %c0_i32, %c0_i32_0 : i32, i32
  }
  func.func @transform_4(%arg0: i32, %arg1: i32) -> (i32, i32, i32) {
    %c0_i32 = arith.constant 0 : i32
    %c0_i32_0 = arith.constant 0 : i32
    %c0_i32_1 = arith.constant 0 : i32
    return %arg1, %c0_i32, %c0_i32_0 : i32, i32, i32
  }
  func.func @transform_5(%arg0: i32, %arg1: i32) -> (i32, i32, i32) {
    %c0_i32 = arith.constant 0 : i32
    %c0_i32_0 = arith.constant 0 : i32
    %c0_i32_1 = arith.constant 0 : i32
    return %arg1, %c0_i32, %c0_i32_0 : i32, i32, i32
  }
  func.func @transform_6(%arg0: i32, %arg1: i32) -> (i32, i32, i32) {
    %c0_i32 = arith.constant 0 : i32
    %c0_i32_0 = arith.constant 0 : i32
    %c0_i32_1 = arith.constant 0 : i32
    return %arg1, %c0_i32, %c0_i32_0 : i32, i32, i32
  }
  func.func @transform_7(%arg0: i32, %arg1: i32) -> (i32, i32, i32) {
    %c0_i32 = arith.constant 0 : i32
    %c0_i32_0 = arith.constant 0 : i32
    %c0_i32_1 = arith.constant 0 : i32
    return %arg1, %c0_i32, %c0_i32_0 : i32, i32, i32
  }
  func.func @transform_8(%arg0: i32, %arg1: i32) -> (i32, i32, i32) {
    %c0_i32 = arith.constant 0 : i32
    %c0_i32_0 = arith.constant 0 : i32
    %c0_i32_1 = arith.constant 0 : i32
    return %arg1, %c0_i32, %c0_i32_0 : i32, i32, i32
  }
  func.func @transform_9(%arg0: i32, %arg1: i32) -> (i32, i32, i32) {
    %c0_i32 = arith.constant 0 : i32
    %c0_i32_0 = arith.constant 0 : i32
    %c0_i32_1 = arith.constant 0 : i32
    return %arg1, %c0_i32, %c0_i32_0 : i32, i32, i32
  }
  func.func @transform_10(%arg0: i32, %arg1: i32) -> (i32, i32, i32) {
    %c0_i32 = arith.constant 0 : i32
    %c0_i32_0 = arith.constant 0 : i32
    %c0_i32_1 = arith.constant 0 : i32
    return %arg1, %c0_i32, %c0_i32_0 : i32, i32, i32
  }
  func.func @transform_11(%arg0: i32, %arg1: i32) -> (i32, i32, i32) {
    %c0_i32 = arith.constant 0 : i32
    %c0_i32_0 = arith.constant 0 : i32
    %c0_i32_1 = arith.constant 0 : i32
    return %arg1, %c0_i32, %c0_i32_0 : i32, i32, i32
  }
  func.func @transform_12(%arg0: i32, %arg1: i32) -> (i32, i32, i32) {
    %c0_i32 = arith.constant 0 : i32
    %c0_i32_0 = arith.constant 0 : i32
    %c0_i32_1 = arith.constant 0 : i32
    return %arg1, %c0_i32, %c0_i32_0 : i32, i32, i32
  }
  func.func @transform_13(%arg0: i32, %arg1: i32) -> (i32, i32, i32) {
    %c0_i32 = arith.constant 0 : i32
    %c0_i32_0 = arith.constant 0 : i32
    %c0_i32_1 = arith.constant 0 : i32
    return %arg1, %c0_i32, %c0_i32_0 : i32, i32, i32
  }
  func.func @transform_14(%arg0: i32, %arg1: i32) -> (i32, i32, i32) {
    %c0_i32 = arith.constant 0 : i32
    %c0_i32_0 = arith.constant 0 : i32
    %c0_i32_1 = arith.constant 0 : i32
    return %arg1, %c0_i32, %c0_i32_0 : i32, i32, i32
  }
  func.func @transform_15(%arg0: i32, %arg1: i32) -> (i32, i32, i32) {
    %c0_i32 = arith.constant 0 : i32
    %c0_i32_0 = arith.constant 0 : i32
    %c0_i32_1 = arith.constant 0 : i32
    return %arg1, %c0_i32, %c0_i32_0 : i32, i32, i32
  }
  func.func @transform_16(%arg0: i32, %arg1: i32) -> (i32, i32) {
    %c0_i32 = arith.constant 0 : i32
    %c0_i32_0 = arith.constant 0 : i32
    %c0_i32_1 = arith.constant 0 : i32
    return %c0_i32, %c0_i32_0 : i32, i32
  }
  func.func @transform_17(%arg0: i32, %arg1: i32) -> (i32, i32) {
    %c0_i32 = arith.constant 0 : i32
    %c0_i32_0 = arith.constant 0 : i32
    %c0_i32_1 = arith.constant 0 : i32
    return %c0_i32, %c0_i32_0 : i32, i32
  }
  func.func @transform_18(%arg0: i32, %arg1: i32) -> (i32, i32) {
    %c0_i32 = arith.constant 0 : i32
    %c0_i32_0 = arith.constant 0 : i32
    %c0_i32_1 = arith.constant 0 : i32
    return %c0_i32, %c0_i32_0 : i32, i32
  }
  func.func @transform_19(%arg0: i32, %arg1: i32) -> (i32, i32) {
    %c0_i32 = arith.constant 0 : i32
    %c0_i32_0 = arith.constant 0 : i32
    %c0_i32_1 = arith.constant 0 : i32
    return %c0_i32, %c0_i32_0 : i32, i32
  }
  func.func @transform_20(%arg0: i32, %arg1: i32) -> (i32, i32, i32) {
    %c0_i32 = arith.constant 0 : i32
    %c0_i32_0 = arith.constant 0 : i32
    %c0_i32_1 = arith.constant 0 : i32
    return %arg0, %c0_i32, %c0_i32_0 : i32, i32, i32
  }
}

</mosaic_0001>

<bundles_post_ra>
// kernel: emotion_classifier_forward.1
= control target key start
LH: loop header
LB: loop body
LE: loop exit
PB: predicated region body
PF: predicated region fallthrough
CT: control target
= control target key end

     0   :  { %s2879_s0 = inlined_call_operand.vmem [shape: f32[2,8,32], index: 0, kind: input, shape index: {}]   ;;  %s2880_s1 = inlined_call_operand.vmem [shape: f32[2,1,8], index: 1, kind: input, shape index: {}]   ;;  %s2881_s2 = inlined_call_operand.vmem [shape: f32[1,32], index: 2, kind: input, shape index: {}]   ;;  %s2882_s3 = inlined_call_operand.vmem [shape: f32[1,32], index: 3, kind: input, shape index: {}]   ;;  %s2883_s4 = inlined_call_operand.vmem [shape: bf16[2,32,96], index: 4, kind: input, shape index: {}]   ;;  %s2884_s5 = inlined_call_operand.vmem [shape: f32[2,1,96], index: 5, kind: input, shape index: {}]   ;;  %s2885_s6 = inlined_call_operand.vmem [shape: bf16[2,32,32], index: 6, kind: input, shape index: {}]   ;;  %s2886_s7 = inlined_call_operand.vmem [shape: f32[2,1,32], index: 7, kind: input, shape index: {}]   ;;  %s2887_s8 = inlined_call_operand.vmem [shape: f32[2,1,32], index: 8, kind: input, shape index: {}]   ;;  %s2888_s9 = inlined_call_operand.vmem [shape: f32[2,1,32], index: 9, kind: input, shape index: {}]   ;;  %s2889_s10 = inlined_call_operand.vmem [shape: bf16[2,32,64], index: 10, kind: input, shape index: {}]   ;;  %s2890_s11 = inlined_call_operand.vmem [shape: f32[2,1,64], index: 11, kind: input, shape index: {}]   ;;  %s2891_s12 = inlined_call_operand.vmem [shape: bf16[2,64,32], index: 12, kind: input, shape index: {}]   ;;  %s2892_s13 = inlined_call_operand.vmem [shape: f32[2,1,32], index: 13, kind: input, shape index: {}]   ;;  %s2893_s14 = inlined_call_operand.vmem [shape: f32[2,1,32], index: 14, kind: input, shape index: {}]   ;;  %s2894_s15 = inlined_call_operand.vmem [shape: f32[2,1,32], index: 15, kind: input, shape index: {}]   ;;  %s2895_s16 = inlined_call_operand.vmem [shape: bf16[32,32], index: 16, kind: input, shape index: {}]   ;;  %s2896_s17 = inlined_call_operand.vmem [shape: f32[1,32], index: 17, kind: input, shape index: {}]   ;;  %s2897_s18 = inlined_call_operand.vmem [shape: bf16[32,128], index: 18, kind: input, shape index: {}]   ;;  %s2898_s19 = inlined_call_operand.vmem [shape: f32[1,128], index: 19, kind: input, shape index: {}]   ;;  %s2899_s20 = inlined_call_operand.hbm [shape: f32[2,1,128], index: 20, kind: output, shape index: {}]  }
   0x1   :  { %2915 = sst [smem:[#allocation18_spill]] %s2879_s0 }
   0x2   :  { %2916 = sst [smem:[#allocation19_spill]] %s2880_s1 }
   0x3   :  { %2917 = sst [smem:[#allocation20_spill]] %s2881_s2 }
   0x4   :  { %2918 = sst [smem:[#allocation21_spill]] %s2882_s3 }
   0x5   :  { %2919 = sst [smem:[#allocation22_spill]] %s2883_s4 }
   0x6   :  { %2920 = sst [smem:[#allocation23_spill]] %s2885_s6 }
   0x7   :  { %2921 = sst [smem:[#allocation24_spill]] %s2889_s10 }
   0x8   :  { %2922 = sst [smem:[#allocation25_spill]] %s2890_s11 }
   0x9   :  { %2923 = sst [smem:[#allocation26_spill]] %s2893_s14 }
   0xa   :  { %2924 = sst [smem:[#allocation27_spill]] %s2894_s15 }
   0xb   :  { %2925 = sst [smem:[#allocation28_spill]] %s2895_s16 }
   0xc   :  { %2926 = sst [smem:[#allocation29_spill]] %s2896_s17 }
   0xd   :  { %2927 = sst [smem:[#allocation30_spill]] %s2897_s18 }
   0xe   :  { %2928 = sst [smem:[#allocation31_spill]] %s2898_s19 }
   0xf   :  { %2929 = sst [smem:[#allocation32_spill]] %s2899_s20 }
  0x10   :  { %25 = vsyncpa [#allocation4], 0 }
  0x11   :  { %27 = vsyncpa [#allocation4 + $0x1], 0  ;;  %s2518_s1 = smov 0   ;;  %s2520_s22 = smov 0  }
  0x12   :  { %s2522_s23 = smov 0   ;;  %s2524_s24 = smov 0  }
  0x13   :  { %s2526_s2 = smov 0   ;;  %s2528_s25 = smov 0  }
  0x14   :  { %s2530_s3 = smov 0   ;;  %s2532_s26 = smov 0  }
  0x15 LB: > { %2930 = sst [smem:[#allocation6_spill]] %s2372_s1  ;;  %s1984_s27 = sadd.s32 4294967295, %s2400_s26   ;;  %s2400_s26 = sphi %s2532_s26, %s33_s26   ;;  %s2396_s3 = sphi %s2530_s3, %s2981_s3   ;;  %s2392_s25 = sphi %s2528_s25, %s2980_s25   ;;  %s2388_s2 = sphi %s2526_s2, %s2979_s2   ;;  %s2384_s24 = sphi %s2524_s24, %s2978_s24   ;;  %s2380_s23 = sphi %s2522_s23, %s2977_s23   ;;  %s2376_s22 = sphi %s2520_s22, %s2983_s22   ;;  %s2372_s1 = sphi %s2518_s1, %s2982_s1  }
  0x16   : > { %2931 = sst [smem:[#allocation7_spill]] %s2380_s23  ;;  %s1985_s28 = sadd.s32 4294967294, %s2400_s26  }
  0x17   : > { %2932 = sst [smem:[#allocation8_spill]] %s2384_s24  ;;  %s42_s4 = sadd.s32 1, %s2392_s25 }
  0x18   : > { %2933 = sst [smem:[#allocation9_spill]] %s2388_s2  ;;  %p43_p0 = scmp.ge.s32.totalorder %s42_s4, 2 }
  0x19   : > { %2934 = sst [smem:[#allocation10_spill]] %s2392_s25  ;;  %s45_s29 = sadd.s32 1, %s2396_s3 }
  0x1a   : > { %2935 = sst [smem:[#allocation11_spill]] %s2396_s3  ;;  %p552_p1 = scmp.ne.s32.totalorder %s2380_s23, %s2376_s22 }
  0x1b   : > { %2936 = sst [smem:[#allocation12_spill]] %s2400_s26  ;;  %p553_p2 = scmp.eq.s32.totalorder %s1984_s27, 3 }
  0x1c   : > { %s2985_s4 = smov (%p43_p0, %s42_s4), 0  ;;  %s2987_s29 = smov (!%p43_p0, %s45_s29), %s2396_s3 }
  0x1d   : > { %2937 = sst [smem:[#allocation13_spill]] %s2985_s4  ;;  %p2567_p3 = por %p553_p2, %p552_p1 }
  0x1e   : > { %p558_p4 = scmp.ne.s32.totalorder %s2376_s22, %s2372_s1  ;;  %p47_p5 = scmp.ge.s32.totalorder %s2987_s29, 2 }
  0x1f   : > { %s2938_s30 = scalar_select %p2567_p3, 1, 0 }
  0x20   : > { %p559_p6 = scmp.eq.s32.totalorder %s1985_s28, 3  ;;  %p1988_p7 = scmp.ge.s32.totalorder %s2400_s26, 1 }
  0x21   : > { %2939 = sst [smem:[#allocation14_spill]] %s2938_s30  ;;  %p688_p8 = scmp.lt.s32.totalorder %s2400_s26, 5 }
  0x22   : > { %s2989_s29 = smov (%p47_p5, %s2987_s29), 0  ;;  %p2577_p9 = por %p559_p6, %p558_p4 }
  0x23   : > { %2940 = sst [smem:[#allocation15_spill]] %s2989_s29  ;;  %p689_p10 = pnand %p1988_p7, %p688_p8 }
  0x24   : > { %s2941_s0 = scalar_select %p2577_p9, 1, 0 }
  0x25   : > { %s539_s21 = ssub.s32 %s2396_s3, %s2989_s29  ;;  %s542_s27 = sadd.s32 1, %s2380_s23 }
  0x26   : > { %2942 = sst [smem:[#allocation16_spill]] %s2941_s0  ;;  %p540_p11 = scmp.eq.s32.totalorder %s539_s21, 0 }
  0x27   : > { %692 = sbr.rel (%p689_p10) target bundleno = 4257 (0x10a1), region = 100  ;;  %p791_p12 = scmp.lt.s32.totalorder (!%p689_p10), %s2388_s2, 1 }
  0x28   : > { %s2585_s4 = scalar_select %p540_p11, %s2380_s23, %s542_s27  }
  0x29   : > { %p798_p13 = scmp.lt.s32.totalorder (!%p689_p10), %s2384_s24, 1  ;;  %s2945_s1 = sld [smem:[#allocation18_spill]] (!%p689_p10) }
  0x2a   : > { %2943 = sst [smem:[#allocation17_spill]] %s2585_s4  ;;  %s2947_s6 = sld [smem:[#allocation23_spill]] (!%p689_p10) }
  0x2b   : > { %s2946_s19 = sld [smem:[#allocation22_spill]] (!%p689_p10)  ;;  %s2948_s10 = sld [smem:[#allocation24_spill]] (!%p689_p10) }
  0x2c   : > { %s2949_s11 = sld [smem:[#allocation25_spill]] (!%p689_p10)  ;;  %s2951_s15 = sld [smem:[#allocation27_spill]] (!%p689_p10) }
  0x2d   : > { %s2953_s23 = sld [smem:[#allocation8_spill]] (!%p689_p10) }
  0x2e   : > { %s2591_s25 = scalar_select %p791_p12, %s2388_s2, 1 }
  0x2f   : > { %s2594_s0 = scalar_select %p798_p13, %s2384_s24, 1 }
  0x30   : > { %s1989_s21 = sshll.u32 %s2591_s25, 3 }
  0x31   : > { %s794_s26 = scalar_lea.vmem %s2945_s1, %s1989_s21  ;;  %s2047_s20 = sshll.u32 %s2594_s0, 4 }
  0x32   : > { %s2608_s17 = scalar_lea.vmem %s2946_s19, %s2047_s20  ;;  %s2617_s28 = scalar_lea.vmem %s2947_s6, %s2047_s20 }
  0x33   : > { %s2634_s18 = scalar_lea.vmem %s2948_s10, %s2047_s20  ;;  %s2640_s24 = scalar_lea.vmem %s2949_s11, %s2594_s0 }
  0x34   : > { %s2050_s29 = sshll.u32 %s2594_s0, 5  ;;  %s2647_s1 = scalar_lea.vmem %s2892_s13, %s2594_s0 }
  0x35   : > { %s2652_s2 = scalar_lea.vmem %s2891_s12, %s2050_s29  ;;  %s2950_s20 = sld [smem:[#allocation26_spill]] }
  0x36   : > { %s2664_s6 = scalar_lea.vmem %s2951_s15, %s2594_s0  ;;  %s2952_s10 = sand.u32 1, %s2376_s22  }
  0x37   : > { %s2668_s11 = scalar_lea.vmem [#allocation3], %s2952_s10  ;;  %p1998_p0 = scmp.ne.s32.totalorder %s2953_s23, 0 }
  0x38   : > { %v847_v0 = vld [vmem:[%s794_s26] sm:$0xff] (!%p1998_p0)  ;;  %vm850_vm0 = vcmask (!%p1998_p0), 261120   ;;  %s2954_s30 = sld [smem:[#allocation20_spill]] (!%p1998_p0)  ;;  %s2955_s27 = sld [smem:[#allocation21_spill]] (!%p1998_p0) }
  0x39   : > { %846 = sbr.rel (%p1998_p0) target bundleno = 371 (0x173), region = 104  ;;  %v851_v1 = vsel (!%p1998_p0), %vm850_vm0, %v847_v0, 0.0 }
  0x3a   : > { %852 = vadd.xlane.f32.xlu0 (!%p1998_p0), %v851_v1 }
  0x3b   : > { %s2658_s16 = scalar_lea.vmem %s2950_s20, %s2594_s0 }
  0x3e   : > { %v1999_v11 = vld [vmem:[%s2954_s30] ss:$0 sm:$0xff] (!%p1998_p0) }
  0x3f   : > { %v2000_v13 = vld [vmem:[%s2955_s27] ss:$0 sm:$0xff] (!%p1998_p0) }
  0xc7   : > { %v853_v2 = vpop.xlane.xlu0 %852 }
  0xc8   : > { %v855_v3 = vmul.f32 0.03125, %v853_v2 }
  0xca   : > { %v856_v4 = vsub.f32 %v847_v0, %v855_v3 }
  0xcc   : > { %v857_v5 = vmul.f32 %v856_v4, %v856_v4 }
  0xce   : > { %v858_v6 = vsel %vm850_vm0, %v857_v5, 0.0 }
  0xcf   : > { %859 = vadd.xlane.f32.xlu0 %v858_v6 }
 0x15c   : > { %v860_v7 = vpop.xlane.xlu0 %859 }
 0x15d   : > { %v861_v8 = vmul.f32 0.03125, %v860_v7 }
 0x15f   : > { %v862_v9 = vadd.f32 1e-12, %v861_v8 }
 0x161   : > { %2264 = vrsqrt.f32 %v862_v9 }
 0x16b   : > { %v2265_v10 = vpop.eup %2264 }
 0x16c   : > { %v864_v12 = vmul.f32 %v2265_v10, %v856_v4 }
 0x16e   : > { %v871_v14 = vmul.f32 %v1999_v11, %v864_v12 }
 0x170   : > { %v878_v15 = vadd.f32 %v2000_v13, %v871_v14 }
 0x172   : > { %879 = vst.msk [vmem:[#allocation2] sm:$0xff] %vm850_vm0, %v878_v15 }
 0x173 PF: > { %v2266_v16 = vld [vmem:[%s2608_s17] sm:$0xff]   ;;  %v2402_v17 = vmov 0.0   ;;  %v2267_v18 = vld [vmem:[%s2608_s17 + $0x8] sm:$0xff]   ;;  %vm2403_vm1 = vmmov 0   ;;  %vm905_vm2 = vcmask 261120   ;;  %s2956_s19 = scalar_lea.vmem %s2884_s5, %s2594_s0  ;;  %s2404_s3 = smov 112  }
 0x174   : > { %2087 = vmatprep.subr.bf16.mxu0 %v2402_v17  ;;  %2095 = vmatprep.subr.bf16.mxu1 %v2402_v17  ;;  %v2001_v21 = vld [vmem:[%s2956_s19] ss:$0 sm:$0xff]  ;;  %s2405_s20 = smov 96   ;;  %vm965_vm3 = vcmask 130048   ;;  %s2957_s23 = sld [smem:[#allocation19_spill]]  ;;  %vm1061_vm4 = vcmask 64512  }
 0x175   : > { %2088 = vmatpush3.bf16.msra.mxu0 %v2266_v16  ;;  %2091 = vmatprep.mubr.msk.bf16.mxu0 %vm2403_vm1, %v2402_v17  ;;  %s2406_s21 = smov 64   ;;  %vm1091_vm5 = vcmask 1043456   ;;  %v2268_v5 = vld [vmem:[%s2617_s28] sm:$0xff]   ;;  %v2269_v6 = vld [vmem:[%s2617_s28 + $0x8] sm:$0xff]   ;;  %s2959_s26 = scalar_lea.vmem %s2886_s7, %s2594_s0 }
 0x176   : > { %2089 = vmatprep.subr.bf16.mxu0 %v2402_v17  ;;  %2097 = vmatprep.mubr.msk.bf16.mxu1 %vm2403_vm1, %v2402_v17  ;;  %s2960_s17 = scalar_lea.vmem %s2887_s8, %s2594_s0 }
 0x179   : > { %v2686_v19 = vld [vmem:[#allocation2] sm:$0xff]  ;;  %2090 = vmatpush3.bf16.msra.mxu0 %v2267_v18 }
 0x17a   : > { %v881_v20 = vpack.c.bf16 %v2686_v19, %v2686_v19  ;;  %2101 = vmatprep.subr.bf16.mxu0 %v2402_v17  ;;  %s2958_s10 = scalar_lea.vmem %s2957_s23, %s2591_s25  ;;  %s2407_s25 = smov 16  }
 0x17b   : > { %v2005_v34 = vld [vmem:[%s2958_s10] ss:$0 sm:$0xff] }
 0x17c   : > { %2092 = vmatmul.mubr.msk.bf16.vlgmr.msra.gmra.mrb[0].mxu0 %vm905_vm2, %v881_v20 }
 0x17d   : > { %2103 = vmatprep.mubr.msk.bf16.mxu0 %vm2403_vm1, %v2402_v17 }
 0x24f   : > { %v943_v22 = vpop.f32.mrb[0].mxu0 }
 0x250   : > { %v944_v23 = vadd.f32 %v2001_v21, %v943_v22  ;;  %v2093_v24 = vpop.f32.mrb[1].mxu0 }
 0x251   : > { %v946_v25 = vpop.f32.mrb[2].mxu0 }
 0x252   : > { %v954_v26 = vpack.c.bf16 %v944_v23, %v944_v23  ;;  %950 = vrot.lane.b32.xlu0 %v944_v23, %s2404_s3  ;;  %v2094_v27 = vpop.f32.mrb[3].mxu0  ;;  %s2961_s3 = scalar_lea.vmem %s2888_s9, %s2594_s0 }
 0x254   : > { %963 = vrot.lane.b32.xlu1 %v954_v26, %s2405_s20 }
 0x2c4   : > { %v951_v28 = vpop.permute.xlu0 %950 }
 0x2c5   : > { %v955_v29 = vpack.c.bf16 %v951_v28, %v951_v28 }
 0x2c6   : > { %v964_v30 = vpop.permute.xlu1 %963 }
 0x2c7   : > { %1013 = vrot.lane.b32.xlu0 %v955_v29, %s2405_s20  ;;  %v970_v31 = vsel %vm965_vm3, %v964_v30, 0  ;;  %s2962_s20 = sld [smem:[#allocation8_spill]] }
 0x2c8   : > { %2096 = vmatpush3.bf16.xpose.msra.mxu1 %v970_v31 }
 0x2c9   : > { %2107 = vmatprep.subr.bf16.mxu1 %v2402_v17 }
 0x2cd   : > { %p2016_p1 = scmp.eq.s32.totalorder %s2962_s20, 1 }
 0x2ce   : > { %vm2409_vm6 = vmmov (!%p2016_p1), 0   ;;  %vm1407_vm7 = vcmask (!%p2016_p1), 523264  }
 0x2cf   : > { %2098 = vmatmul.mubr.msk.bf16.vlgmr.msra.gmra.mrb[0].mxu1 %vm965_vm3, %v954_v26 }
 0x2d0   : > { %2109 = vmatprep.mubr.msk.bf16.mxu1 %vm2403_vm1, %v2402_v17 }
 0x339   : > { %v1014_v32 = vpop.permute.xlu0 %1013 }
 0x33a   : > { %v1019_v33 = vsel %vm965_vm3, %v1014_v32, 0 }
 0x33b   : > { %2102 = vmatpush3.bf16.xpose.msra.mxu0 %v1019_v33 }
 0x33c   : > { %2113 = vmatprep.subr.bf16.mxu0 %v2402_v17 }
 0x342   : > { %2104 = vmatmul.mubr.msk.bf16.vlgmr.msra.gmra.mrb[4].mxu0 %vm965_vm3, %v955_v29 }
 0x343   : > { %2115 = vmatprep.mubr.msk.bf16.mxu0 %vm2403_vm1, %v2402_v17 }
 0x3a2   : > { %v1006_v35 = vpop.f32.mrb[0].mxu1 }
 0x3a3   : > { %v1007_v36 = vadd.f32 %v2005_v34, %v1006_v35  ;;  %v2099_v37 = vpop.f32.mrb[1].mxu1 }
 0x3a4   : > { %v1009_v38 = vpop.f32.mrb[2].mxu1  ;;  %v2015_v37 = vld [vmem:[%s2961_s3] ss:$0 sm:$0xff] }
 0x3a5   : > { %v2100_v39 = vpop.f32.mrb[3].mxu1  ;;  %v1062_v40 = vsel %vm1061_vm4, %v1007_v36, -inf }
 0x3a6   : > { %1063 = vmax.xlane.f32.xlu0 %v1062_v40  ;;  %v2280_v40 = vld [vmem:[%s2634_s18] sm:$0xff] (!%p2016_p1)  }
 0x415   : > { %v1055_v41 = vpop.f32.mrb[4].mxu0 }
 0x416   : > { %v1056_v42 = vadd.f32 %v2005_v34, %v1055_v41  ;;  %v2105_v43 = vpop.f32.mrb[5].mxu0  ;;  %v2408_v41 = vmov (!%p2016_p1), 0.0  }
 0x417   : > { %v1058_v44 = vpop.f32.mrb[6].mxu0 }
 0x418   : > { %v2106_v45 = vpop.f32.mrb[7].mxu0  ;;  %v1065_v46 = vsel %vm1061_vm4, %v1056_v42, -inf  ;;  %v2282_v44 = vld [vmem:[%s2652_s2] sm:$0xff] (!%p2016_p1)  }
 0x419   : > { %1066 = vmax.xlane.f32.xlu1 %v1065_v46  ;;  %v2283_v45 = vld [vmem:[%s2652_s2 + $0x8] sm:$0xff] (!%p2016_p1)   ;;  %v2284_v46 = vld [vmem:[%s2652_s2 + $0x10] sm:$0xff] (!%p2016_p1)  }
 0x42a   : > { %1135 = vrot.lane.b32.xlu1 %v955_v29, %s2406_s21 }
 0x433   : > { %v1064_v47 = vpop.xlane.xlu0 %1063 }
 0x434   : > { %v1068_v48 = vsub.f32 %v1007_v36, %v1064_v47  ;;  %v2285_v47 = vld [vmem:[%s2652_s2 + $0x18] sm:$0xff] (!%p2016_p1)  }
 0x436   : > { %v1070_v51 = vmul.f32 1.442695, %v1068_v48  ;;  %v2017_v48 = vld [vmem:[%s2640_s24] ss:$0 sm:$0xff] (!%p2016_p1) }
 0x4a6   : > { %v1067_v49 = vpop.xlane.xlu1 %1066 }
 0x4a7   : > { %v1069_v50 = vsub.f32 %v1056_v42, %v1067_v49  ;;  %v2281_v42 = vld [vmem:[%s2634_s18 + $0x8] sm:$0xff] (!%p2016_p1)  }
 0x4a9   : > { %v1072_v52 = vmul.f32 1.442695, %v1069_v50 }
 0x4aa   : > { %v1136_v53 = vpop.permute.xlu1 %1135 }
 0x4ab   : > { %2270 = vpow2.f32 %v1072_v52  ;;  %v1141_v54 = vsel %vm1091_vm5, %v1136_v53, 0 }
 0x4ac   : > { %2114 = vmatpush3.bf16.msra.mxu0 %v1141_v54  ;;  %2272 = vpow2.f32 %v1070_v51 }
 0x4ad   : > { %2127 = vmatprep.subr.bf16.mxu0 (!%p2016_p1), %v2408_v41 }
 0x4b5   : > { %v2271_v55 = vpop.eup %2270 }
 0x4b6   : > { %v1077_v56 = vsel %vm1061_vm4, %v2271_v55, 0.0  ;;  %v2273_v57 = vpop.eup %2272 }
 0x4b7   : > { %1078 = vadd.xlane.f32.xlu0 %v1077_v56  ;;  %v1074_v58 = vsel %vm1061_vm4, %v2273_v57, 0.0 }
 0x4bb   : > { %1075 = vadd.xlane.f32.xlu0 %v1074_v58 }
 0x4d1   : > { %1086 = vrot.lane.b32.xlu0 %v954_v26, %s2406_s21 }
 0x544   : > { %v1079_v59 = vpop.xlane.xlu0 %1078 }
 0x545   : > { %2274 = vrcp.f32 %v1079_v59 }
 0x548   : > { %v1076_v60 = vpop.xlane.xlu0 %1075 }
 0x549   : > { %2276 = vrcp.f32 %v1076_v60 }
 0x54c   : > { %v1087_v61 = vpop.permute.xlu0 %1086 }
 0x54d   : > { %v1093_v62 = vsel %vm1091_vm5, %v1087_v61, 0 }
 0x54e   : > { %2108 = vmatpush3.bf16.msra.mxu1 %v1093_v62 }
 0x54f   : > { %v2275_v63 = vpop.eup %2274  ;;  %2119 = vmatprep.subr.bf16.mxu1 %v2402_v17 }
 0x550   : > { %v1083_v0 = vmul.f32 %v2275_v63, %v2271_v55 }
 0x552   : > { %v1085_v1 = vpack.c.bf16 %v1083_v0, %v1083_v0  ;;  %v2021_v0 = vld [vmem:[%s2647_s1] ss:$0 sm:$0xff] (!%p2016_p1) }
 0x553   : > { %v2277_v2 = vpop.eup %2276 }
 0x554   : > { %v1082_v3 = vmul.f32 %v2277_v2, %v2273_v57  ;;  %2116 = vmatmul.mubr.msk.bf16.vlgmr.msra.gmra.mrb[8].mxu0 %vm1061_vm4, %v1085_v1 }
 0x555   : > { %2128 = vmatpush3.bf16.msra.mxu0 (!%p2016_p1), %v2280_v40  ;;  %2131 = vmatprep.mubr.msk.bf16.mxu0 (!%p2016_p1), %vm2409_vm6, %v2408_v41 }
 0x556   : > { %v1084_v4 = vpack.c.bf16 %v1082_v3, %v1082_v3  ;;  %2129 = vmatprep.subr.bf16.mxu0 (!%p2016_p1), %v2408_v41 }
 0x558   : > { %2110 = vmatmul.mubr.msk.bf16.vlgmr.msra.gmra.mrb[4].mxu1 %vm1061_vm4, %v1084_v4 }
 0x559   : > { %2123 = vmatprep.mubr.msk.bf16.mxu1 %vm2403_vm1, %v2402_v17  ;;  %2120 = vmatpush3.bf16.msra.mxu1 %v2268_v5 }
 0x55a   : > { %2121 = vmatprep.subr.bf16.mxu1 %v2402_v17  ;;  %v2010_v17 = vld [vmem:[%s2959_s26] ss:$0 sm:$0xff]  ;;  %2130 = vmatpush3.bf16.msra.mxu0 (!%p2016_p1), %v2281_v42 }
 0x55d   : > { %2122 = vmatpush3.bf16.msra.mxu1 %v2269_v6 }
 0x55e   : > { %2135 = vmatprep.subr.bf16.mxu1 (!%p2016_p1), %v2408_v41 }
 0x627   : > { %v1177_v7 = vpop.f32.mrb[8].mxu0 }
 0x628   : > { %1184 = vrot.lane.b32.xlu1 %v1177_v7, %s2407_s25  ;;  %v2117_v8 = vpop.f32.mrb[9].mxu0 }
 0x629   : > { %v1180_v9 = vpop.f32.mrb[10].mxu0 }
 0x62a   : > { %v2118_v10 = vpop.f32.mrb[11].mxu0 }
 0x62b   : > { %v1129_v11 = vpop.f32.mrb[4].mxu1 }
 0x62c   : > { %v2111_v12 = vpop.f32.mrb[5].mxu1 }
 0x62d   : > { %v1132_v13 = vpop.f32.mrb[6].mxu1 }
 0x62e   : > { %v2112_v14 = vpop.f32.mrb[7].mxu1 }
 0x69a   : > { %v1185_v15 = vpop.permute.xlu1 %1184 }
 0x69b   : > { %v1187_v16 = vsel %vm965_vm3, %v1129_v11, %v1185_v15 }
 0x69c   : > { %v1188_v18 = vpack.c.bf16 %v1187_v16, %v1187_v16 }
 0x69e   : > { %2124 = vmatmul.mubr.msk.bf16.vlgmr.msra.gmra.mrb[8].mxu1 %vm905_vm2, %v1188_v18  ;;  %v2027_v18 = vld [vmem:[%s2658_s16] ss:$0 sm:$0xff] (!%p2016_p1) }
 0x69f   : > { %2143 = vmatprep.mubr.msk.bf16.mxu1 (!%p2016_p1), %vm2409_vm6, %v2408_v41  ;;  %2136 = vmatpush3.bf16.msra.mxu1 (!%p2016_p1), %v2282_v44 }
 0x6a0   : > { %2137 = vmatprep.subr.bf16.mxu1 (!%p2016_p1), %v2408_v41 }
 0x6a3   : > { %2138 = vmatpush3.bf16.msra.mxu1 (!%p2016_p1), %v2283_v45 }
 0x6a4   : > { %2139 = vmatprep.subr.bf16.mxu1 (!%p2016_p1), %v2408_v41 }
 0x6a7   : > { %2140 = vmatpush3.bf16.msra.mxu1 (!%p2016_p1), %v2284_v46 }
 0x6a8   : > { %2141 = vmatprep.subr.bf16.mxu1 (!%p2016_p1), %v2408_v41 }
 0x6ab   : > { %2142 = vmatpush3.bf16.msra.mxu1 (!%p2016_p1), %v2285_v47 }
 0x771   : > { %v1249_v20 = vpop.f32.mrb[8].mxu1 }
 0x772   : > { %v1250_v21 = vadd.f32 %v2010_v17, %v1249_v20  ;;  %v2125_v22 = vpop.f32.mrb[9].mxu1  ;;  %v2028_v20 = vld [vmem:[%s2664_s6] ss:$0 sm:$0xff] (!%p2016_p1) }
 0x773   : > { %v1252_v23 = vpop.f32.mrb[10].mxu1 }
 0x774   : > { %v2126_v24 = vpop.f32.mrb[11].mxu1  ;;  %v1255_v25 = vadd.f32 %v1250_v21, %v2686_v19  ;;  %v2014_v19 = vld [vmem:[%s2960_s17] ss:$0 sm:$0xff] }
 0x776   : > { %v1258_v26 = vsel %vm905_vm2, %v1255_v25, 0.0 }
 0x777   : > { %1259 = vadd.xlane.f32.xlu1 %v1258_v26 }
 0x804   : > { %v1260_v27 = vpop.xlane.xlu1 %1259 }
 0x805   : > { %v1262_v28 = vmul.f32 0.03125, %v1260_v27 }
 0x807   : > { %v1263_v29 = vsub.f32 %v1255_v25, %v1262_v28 }
 0x809   : > { %v1264_v30 = vmul.f32 %v1263_v29, %v1263_v29 }
 0x80b   : > { %v1265_v31 = vsel %vm905_vm2, %v1264_v30, 0.0 }
 0x80c   : > { %1266 = vadd.xlane.f32.xlu0 %v1265_v31 }
 0x899   : > { %v1267_v32 = vpop.xlane.xlu0 %1266 }
 0x89a   : > { %v1268_v33 = vmul.f32 0.03125, %v1267_v32 }
 0x89c   : > { %v1269_v34 = vadd.f32 1e-12, %v1268_v33 }
 0x89e   : > { %2278 = vrsqrt.f32 %v1269_v34 }
 0x8a7   : > { %1290 = sbr.rel (%p2016_p1) target bundleno = 2998 (0xbb6), region = 108 }
 0x8a8   : > { %v2279_v35 = vpop.eup %2278 }
 0x8a9   : > { %v1271_v36 = vmul.f32 %v2279_v35, %v1263_v29 }
 0x8ab   : > { %v1278_v38 = vmul.f32 %v2014_v19, %v1271_v36 }
 0x8ad   : > { %v2751_v39 = vadd.f32 %v2015_v37, %v1278_v38 }
 0x8af   : > { %v1291_v43 = vpack.c.bf16 %v2751_v39, %v2751_v39 }
 0x8b1   : > { %2132 = vmatmul.mubr.msk.bf16.vlgmr.msra.gmra.mrb[0].mxu0 %vm905_vm2, %v1291_v43 }
 0x984   : > { %v1352_v49 = vpop.f32.mrb[0].mxu0 }
 0x985   : > { %v1353_v50 = vadd.f32 %v2017_v48, %v1352_v49  ;;  %v2133_v51 = vpop.f32.mrb[1].mxu0 }
 0x986   : > { %v1355_v52 = vpop.f32.mrb[2].mxu0 }
 0x987   : > { %v1358_v53 = vmul.f32 %v1353_v50, %v1353_v50  ;;  %v2134_v54 = vpop.f32.mrb[3].mxu0 }
 0x989   : > { %v1359_v55 = vmul.f32 %v1358_v53, %v1353_v50 }
 0x98b   : > { %v1360_v56 = vmul.f32 0.044715, %v1359_v55 }
 0x98d   : > { %v1361_v57 = vadd.f32 %v1360_v56, %v1353_v50 }
 0x98f   : > { %v1362_v58 = vmul.f32 0.7978846, %v1361_v57 }
 0x991   : > { %2286 = vtanh.f32 %v1362_v58 }
 0x99b   : > { %v2287_v59 = vpop.eup %2286 }
 0x99c   : > { %v1364_v60 = vadd.f32 1.0, %v2287_v59 }
 0x99e   : > { %v1365_v61 = vmul.f32 0.5, %v1364_v60 }
 0x9a0   : > { %v1366_v62 = vmul.f32 %v1365_v61, %v1353_v50 }
 0x9a2   : > { %v1367_v63 = vpack.c.bf16 %v1366_v62, %v1366_v62 }
 0x9a4   : > { %2144 = vmatmul.mubr.msk.bf16.vlgmr.msra.gmra.mrb[0].mxu1 %vm1407_vm7, %v1367_v63 }
 0xa77   : > { %v1445_v1 = vpop.f32.mrb[0].mxu1 }
 0xa78   : > { %v1446_v2 = vadd.f32 %v2021_v0, %v1445_v1  ;;  %v2145_v3 = vpop.f32.mrb[1].mxu1 }
 0xa79   : > { %v1448_v4 = vpop.f32.mrb[2].mxu1 }
 0xa7a   : > { %v1451_v5 = vadd.f32 %v1446_v2, %v2751_v39  ;;  %v2146_v6 = vpop.f32.mrb[3].mxu1 }
 0xa7c   : > { %v1454_v7 = vsel %vm905_vm2, %v1451_v5, 0.0 }
 0xa7d   : > { %1455 = vadd.xlane.f32.xlu0 %v1454_v7 }
 0xb0a   : > { %v1456_v8 = vpop.xlane.xlu0 %1455 }
 0xb0b   : > { %v1457_v9 = vmul.f32 0.03125, %v1456_v8 }
 0xb0d   : > { %v1458_v10 = vsub.f32 %v1451_v5, %v1457_v9 }
 0xb0f   : > { %v1459_v11 = vmul.f32 %v1458_v10, %v1458_v10 }
 0xb11   : > { %v1460_v12 = vsel %vm905_vm2, %v1459_v11, 0.0 }
 0xb12   : > { %1461 = vadd.xlane.f32.xlu0 %v1460_v12 }
 0xb9f   : > { %v1462_v13 = vpop.xlane.xlu0 %1461 }
 0xba0   : > { %v1463_v14 = vmul.f32 0.03125, %v1462_v13 }
 0xba2   : > { %v1464_v15 = vadd.f32 1e-12, %v1463_v14 }
 0xba4   : > { %2288 = vrsqrt.f32 %v1464_v15 }
 0xbae   : > { %v2289_v16 = vpop.eup %2288 }
 0xbaf   : > { %v1466_v17 = vmul.f32 %v2289_v16, %v1458_v10 }
 0xbb1   : > { %v1473_v21 = vmul.f32 %v2027_v18, %v1466_v17 }
 0xbb3   : > { %v1480_v22 = vadd.f32 %v2028_v20, %v1473_v21 }
 0xbb5   : > { %1481 = vst.msk [vmem:[#allocation2] sm:$0xff] %vm905_vm2, %v1480_v22 }
 0xbb6 PF: > { %s2963_s0 = sld [smem:[#allocation8_spill]] }
 0xbbc   : > { %p2029_p2 = scmp.ne.s32.totalorder %s2963_s0, 1 }
 0xbbd   : > { %v2290_v23 = vld [vmem:[%s2634_s18] sm:$0xff] (!%p2029_p2)   ;;  %v2410_v24 = vmov (!%p2029_p2), 0.0   ;;  %v2291_v25 = vld [vmem:[%s2634_s18 + $0x8] sm:$0xff] (!%p2029_p2)   ;;  %vm2411_vm8 = vmmov (!%p2029_p2), 0   ;;  %v1485_v26 = vpack.c.bf16 (!%p2029_p2), %v2751_v39, %v2751_v39  ;;  %v2294_v29 = vld [vmem:[%s2652_s2 + $0x10] sm:$0xff] (!%p2029_p2)   ;;  %vm1589_vm9 = vcmask (!%p2029_p2), 523264  }
 0xbbe   : > { %1484 = sbr.rel (%p2029_p2) target bundleno = 4230 (0x1086), region = 112  ;;  %2147 = vmatprep.subr.bf16.mxu0 (!%p2029_p2), %v2410_v24  ;;  %2155 = vmatprep.subr.bf16.mxu1 (!%p2029_p2), %v2410_v24  ;;  %v2292_v27 = vld [vmem:[%s2652_s2] sm:$0xff] (!%p2029_p2)   ;;  %v2293_v28 = vld [vmem:[%s2652_s2 + $0x8] sm:$0xff] (!%p2029_p2)   ;;  %v2295_v30 = vld [vmem:[%s2652_s2 + $0x18] sm:$0xff] (!%p2029_p2)   ;;  %vm1636_vm10 = vcmask (!%p2029_p2), 253952   ;;  %s2966_s21 = sld [smem:[#allocation30_spill]] (!%p2029_p2) }
 0xbbf   : > { %2148 = vmatpush3.bf16.msra.mxu0 (!%p2029_p2), %v2290_v23  ;;  %2151 = vmatprep.mubr.msk.bf16.mxu0 (!%p2029_p2), %vm2411_vm8, %v2410_v24  ;;  %v1490_v31 = vld [vmem:[%s2640_s24] sm:$0x1] (!%p2029_p2)  ;;  %s2967_s28 = sld [smem:[#allocation29_spill]] (!%p2029_p2)  ;;  %s2968_s27 = sld [smem:[#allocation31_spill]] (!%p2029_p2) }
 0xbc0   : > { %2149 = vmatprep.subr.bf16.mxu0 (!%p2029_p2), %v2410_v24  ;;  %2163 = vmatprep.mubr.msk.bf16.mxu1 (!%p2029_p2), %vm2411_vm8, %v2410_v24  ;;  %v1564_v47 = vld [vmem:[%s2647_s1] sm:$0x1] (!%p2029_p2)  ;;  %s2964_s1 = sld [smem:[#allocation28_spill]] (!%p2029_p2) }
 0xbc1   : > { %2156 = vmatpush3.bf16.msra.mxu1 (!%p2029_p2), %v2292_v27  ;;  %v1634_v1 = vld [vmem:[%s2658_s16] sm:$0x1] (!%p2029_p2) }
 0xbc2   : > { %2157 = vmatprep.subr.bf16.mxu1 (!%p2029_p2), %v2410_v24  ;;  %v1635_v3 = vld [vmem:[%s2664_s6] sm:$0x1] (!%p2029_p2) }
 0xbc3   : > { %2150 = vmatpush3.bf16.msra.mxu0 (!%p2029_p2), %v2291_v25 }
 0xbc4   : > { %2167 = vmatprep.subr.bf16.mxu0 (!%p2029_p2), %v2410_v24  ;;  %v2298_v7 = vld [vmem:[%s2966_s21] sm:$0xff] (!%p2029_p2)   ;;  %v2299_v8 = vld [vmem:[%s2966_s21 + $0x8] sm:$0xff] (!%p2029_p2)  }
 0xbc5   : > { %2158 = vmatpush3.bf16.msra.mxu1 %v2293_v28  ;;  %v1657_v9 = vld [vmem:[%s2967_s28] sm:$0x1] }
 0xbc6   : > { %2152 = vmatmul.mubr.msk.bf16.vlgmr.msra.gmra.mrb[0].mxu0 %vm905_vm2, %v1485_v26  ;;  %2159 = vmatprep.subr.bf16.mxu1 %v2410_v24  ;;  %s2965_s14 = smov %s2964_s1  ;;  %v2296_v60 = vld [vmem:[%s2964_s1] sm:$0xff]  }
 0xbc7   : > { %2171 = vmatprep.mubr.msk.bf16.mxu0 %vm2411_vm8, %v2410_v24  ;;  %2168 = vmatpush3.bf16.msra.mxu0 %v2296_v60  ;;  %v1719_v18 = vld [vmem:[%s2968_s27] sm:$0x1] }
 0xbc8   : > { %2169 = vmatprep.subr.bf16.mxu0 %v2410_v24 }
 0xbc9   : > { %2160 = vmatpush3.bf16.msra.mxu1 %v2294_v29 }
 0xbca   : > { %2161 = vmatprep.subr.bf16.mxu1 %v2410_v24 }
 0xbcd   : > { %2162 = vmatpush3.bf16.msra.mxu1 %v2295_v30 }
 0xc99   : > { %v1540_v32 = vpop.f32.mrb[0].mxu0 }
 0xc9a   : > { %v1541_v33 = vadd.f32 %v1540_v32, %v1490_v31  ;;  %v2153_v34 = vpop.f32.mrb[1].mxu0 }
 0xc9b   : > { %v1543_v35 = vpop.f32.mrb[2].mxu0 }
 0xc9c   : > { %v1546_v19 = vmul.f32 %v1541_v33, %v1541_v33  ;;  %v2154_v36 = vpop.f32.mrb[3].mxu0 }
 0xc9e   : > { %v1547_v37 = vmul.f32 %v1546_v19, %v1541_v33 }
 0xca0   : > { %v1548_v38 = vmul.f32 0.044715, %v1547_v37 }
 0xca2   : > { %v1549_v40 = vadd.f32 %v1548_v38, %v1541_v33 }
 0xca4   : > { %v1550_v41 = vmul.f32 0.7978846, %v1549_v40 }
 0xca6   : > { %2300 = vtanh.f32 %v1550_v41 }
 0xcb0   : > { %v2301_v42 = vpop.eup %2300 }
 0xcb1   : > { %v1552_v43 = vadd.f32 1.0, %v2301_v42 }
 0xcb3   : > { %v1553_v44 = vmul.f32 0.5, %v1552_v43 }
 0xcb5   : > { %v1554_v45 = vmul.f32 %v1553_v44, %v1541_v33 }
 0xcb7   : > { %v1555_v46 = vpack.c.bf16 %v1554_v45, %v1554_v45 }
 0xcb9   : > { %2164 = vmatmul.mubr.msk.bf16.vlgmr.msra.gmra.mrb[0].mxu1 %vm1589_vm9, %v1555_v46 }
 0xd8c   : > { %v1627_v48 = vpop.f32.mrb[0].mxu1 }
 0xd8d   : > { %v1628_v49 = vadd.f32 %v1627_v48, %v1564_v47  ;;  %v2165_v50 = vpop.f32.mrb[1].mxu1 }
 0xd8e   : > { %v1630_v51 = vpop.f32.mrb[2].mxu1 }
 0xd8f   : > { %v1633_v52 = vadd.f32 %v1628_v49, %v2751_v39  ;;  %v2166_v53 = vpop.f32.mrb[3].mxu1  ;;  %v2297_v39 = vld [vmem:[%s2965_s14 + $0x8] sm:$0xff]  }
 0xd90   : > { %2170 = vmatpush3.bf16.msra.mxu0 %v2297_v39 }
 0xd91   : > { %v1637_v54 = vsel %vm1636_vm10, %v1633_v52, 0.0  ;;  %2175 = vmatprep.subr.bf16.mxu0 %v2410_v24 }
 0xd92   : > { %1638 = vadd.xlane.f32.xlu0 %v1637_v54 }
 0xe1f   : > { %v1639_v55 = vpop.xlane.xlu0 %1638 }
 0xe20   : > { %v1640_v56 = vmul.f32 0.03125, %v1639_v55 }
 0xe22   : > { %v1641_v57 = vsub.f32 %v1633_v52, %v1640_v56 }
 0xe24   : > { %v1642_v58 = vmul.f32 %v1641_v57, %v1641_v57 }
 0xe26   : > { %v1643_v59 = vsel %vm1636_vm10, %v1642_v58, 0.0 }
 0xe27   : > { %1644 = vadd.xlane.f32.xlu0 %v1643_v59 }
 0xeb4   : > { %v1645_v61 = vpop.xlane.xlu0 %1644 }
 0xeb5   : > { %v1646_v62 = vmul.f32 0.03125, %v1645_v61 }
 0xeb7   : > { %v1647_v63 = vadd.f32 1e-12, %v1646_v62 }
 0xeb9   : > { %2302 = vrsqrt.f32 %v1647_v63 }
 0xec3   : > { %v2303_v0 = vpop.eup %2302 }
 0xec4   : > { %v1649_v2 = vmul.f32 %v2303_v0, %v1641_v57 }
 0xec6   : > { %v1650_v4 = vmul.f32 %v1649_v2, %v1634_v1 }
 0xec8   : > { %v1651_v5 = vadd.f32 %v1650_v4, %v1635_v3 }
 0xeca   : > { %v1652_v6 = vpack.c.bf16 %v1651_v5, %v1651_v5 }
 0xecc   : > { %2172 = vmatmul.mubr.msk.bf16.vlgmr.msra.gmra.mrb[4].mxu0 %vm905_vm2, %v1652_v6 }
 0xecd   : > { %2179 = vmatprep.mubr.msk.bf16.mxu0 %vm2411_vm8, %v2410_v24  ;;  %2176 = vmatpush3.bf16.msra.mxu0 %v2298_v7 }
 0xece   : > { %2177 = vmatprep.subr.bf16.mxu0 %v2410_v24 }
 0xed1   : > { %2178 = vmatpush3.bf16.msra.mxu0 %v2299_v8 }
 0xf9f   : > { %v1707_v10 = vpop.f32.mrb[4].mxu0 }
 0xfa0   : > { %v1708_v11 = vadd.f32 %v1707_v10, %v1657_v9  ;;  %v2173_v12 = vpop.f32.mrb[5].mxu0 }
 0xfa1   : > { %v1710_v13 = vpop.f32.mrb[6].mxu0 }
 0xfa2   : > { %2304 = vtanh.f32 %v1708_v11  ;;  %v2174_v14 = vpop.f32.mrb[7].mxu0 }
 0xfac   : > { %v2305_v15 = vpop.eup %2304 }
 0xfad   : > { %v1714_v16 = vpack.c.bf16 %v2305_v15, %v2305_v15 }
 0xfaf   : > { %2180 = vmatmul.mubr.msk.bf16.vlgmr.msra.gmra.mrb[8].mxu0 %vm905_vm2, %v1714_v16 }
0x1082   : > { %v1769_v17 = vpop.f32.mrb[8].mxu0 }
0x1083   : > { %v1770_v20 = vadd.f32 %v1769_v17, %v1719_v18  ;;  %v2181_v21 = vpop.f32.mrb[9].mxu0 }
0x1084   : > { %v1772_v22 = vpop.f32.mrb[10].mxu0 }
0x1085   : > { %1775 = vst [vmem:[%s2668_s11] sm:$0x1] %v1770_v20  ;;  %v2182_v23 = vpop.f32.mrb[11].mxu0 }
0x1086 PF: > { %s2969_s17 = sld [smem:[#allocation9_spill]]  ;;  %s2971_s0 = sld [smem:[#allocation32_spill]] }
0x1087   : > { %s1789_s18 = sshll.u32 %s2668_s11, 4  ;;  %s2972_s1 = sand.u32 1, %s2376_s22   ;;  %s1790_s18 = int_to_ptr.vmem [resolvable:$true] %s1789_s18 }
0x1088   : > { %s1777_s2 = scalar_lea.sflag [#allocation4], %s2972_s1  ;;  %s2306_s15 = scalar_lea.vmem %s1790_s18, 16 }
0x1089   : > { %p2307_p4 = scmp.ne.s32.totalorder %s1790_s18, %s2306_s15  ;;  %s2412_s23 = smov [#allocation3]  }
0x108a   : > { %s2310_s10 = sshll.u32 %s2412_s23, 4  ;;  %s2311_s10 = int_to_ptr.vmem [resolvable:$false] %s2310_s10 }
0x108b   : > { %p2308_p5 = pnand %p2307_p4, %p2567_p3  ;;  %s2312_s25 = scalar_lea.vmem %s2311_s10, 32 }
0x108c   : > { %s2044_s19 = sshll.u32 %s2969_s17, 4  ;;  %p2313_p7 = scmp.lt.s32.totalorder %s1790_s18, %s2311_s10 }
0x108d   : > { %s2829_s24 = scalar_lea.hbm %s2971_s0, %s2044_s19  ;;  %p2309_p6 = pneg %p2308_p5 }
0x108e   : > { %p2314_p8 = scmp.lt.s32.totalorder %s2312_s25, %s2306_s15 }
0x1090   : > { %p2315_p10 = por %p2314_p8, %p2313_p7 }
0x1092   : > { %p2316_p11 = pnand %p2315_p10, %p2309_p6 }
0x1094   : > { %2319 = shalt.err (!%p2316_p11)
}
0x1095   : > { %s2320_s11 = scalar_lea.hbm %s2829_s24, 16  ;;  %s2324_s16 = scalar_lea.hbm %s2971_s0, 32 }
0x1096   : > { %p2321_p12 = scmp.ne.s32.totalorder %s2829_s24, %s2320_s11  ;;  %p2325_p1 = scmp.lt.u32.totalorder %s2829_s24, %s2971_s0 }
0x1097   : > { %p2326_p2 = scmp.lt.u32.totalorder %s2324_s16, %s2320_s11  ;;  %p2328_p5 = scmp.lt.u32.totalorder %s2320_s11, %s2829_s24 }
0x1098   : > { %p2322_p13 = pnand %p2321_p12, %p2567_p3 }
0x1099   : > { %p2327_p4 = por %p2326_p2, %p2325_p1 }
0x109a   : > { %p2323_p0 = pneg %p2322_p13 }
0x109b   : > { %p2329_p6 = por %p2328_p5, %p2327_p4 }
0x109d   : > { %p2330_p7 = pnand %p2329_p6, %p2323_p0 }
0x109f   : > { %2333 = shalt.err (!%p2330_p7)
}
0x10a0   : > { %2183 = dma.vmem_to_hbm [thread:$0]  (%p2567_p3), %s1790_s18, 16, %s2829_s24, %s1777_s2  }
0x10a1 PF: > { %s2973_s29 = sld [smem:[#allocation12_spill]]  ;;  %s2974_s27 = sld [smem:[#allocation6_spill]] }
0x10a7   : > { %p2189_p8 = scmp.ge.s32.totalorder %s2973_s29, 2  ;;  %s1801_s19 = sand.u32 1, %s2974_s27  }
0x10a8   : > { %s1802_s3 = scalar_lea.sflag [#allocation4], %s1801_s19 }
0x10a9   : > { %p2186_p10 = pnand %p2189_p8, %p2577_p9 }
0x10ab   : > { %2367 = dma.done.wait (!%p2186_p10), %s1802_s3, 16  }
0x10ac   : > { %2369 = vsyncadd (!%p2186_p10), %s1802_s3, 4294967280  ;;  %s33_s26 = sadd.s32 1, %s2973_s29   ;;  %s2976_s20 = sld [smem:[#allocation7_spill]] }
0x10ad   : > { %p30_p11 = scmp.ge.s32.totalorder %s33_s26, 6   ;;  %s2977_s23 = sld [smem:[#allocation17_spill]] }
0x10ae   : > { %s2978_s24 = sld [smem:[#allocation10_spill]]  ;;  %s2979_s2 = sld [smem:[#allocation11_spill]] }
0x10af   : > { %s2980_s25 = sld [smem:[#allocation13_spill]]  ;;  %s2981_s3 = sld [smem:[#allocation15_spill]] }
0x10b0   : > { %s2982_s1 = smov %s2376_s22  ;;  %32 = sbr.rel (!%p30_p11) target bundleno = 21 (0x15), region = 186 }
0x10b2   : > { %s2983_s22 = smov %s2976_s20 }
0x10b7   :  { %1806 = vsyncpa [#allocation4], 1 }
0x10b8   :  { %1808 = vsyncpa [#allocation4 + $0x1], 1 }

</bundles_post_ra>
